<compile_context>
chip_gen: v7x
topology: tpu7x:2x2x1
jax: 0.10.0
libtpu: 0.0.40
codegen_flags: <defaults>
</compile_context>

<pallas_src>
import jax
import jax.numpy as jnp
from jax.experimental import pallas as pl
from jax.experimental.pallas import tpu as pltpu


def _mlp_kernel(x_ref,
                w1_ref, b1_ref,
                w2_ref, b2_ref,
                w3_ref, b3_ref,
                w4_ref, b4_ref,
                w5_ref, b5_ref,
                o_ref):
    # ---- Layer 1: (TM, 3) @ (3, 128) is too skinny for the MXU; do 3 VPU FMAs.
    x = x_ref[...]                     # (TM, 3) f32
    w1 = w1_ref[...]                   # (3, 128) f32
    h = (x[:, 0:1] * w1[0:1, :]
         + x[:, 1:2] * w1[1:2, :]
         + x[:, 2:3] * w1[2:3, :]
         + b1_ref[...])
    h = jnp.maximum(h, 0.0)            # (TM, 128) f32

    # ---- Layers 2-4: bf16 MXU matmuls, f32 accumulation, f32 bias + ReLU.
    def dense_relu(h_f32, w_ref, b_ref):
        a = jnp.dot(h_f32.astype(jnp.bfloat16), w_ref[...],
                    preferred_element_type=jnp.float32) + b_ref[...]
        return jnp.maximum(a, 0.0)

    h = dense_relu(h, w2_ref, b2_ref)
    h = dense_relu(h, w3_ref, b3_ref)
    h = dense_relu(h, w4_ref, b4_ref)

    # ---- Output layer: W5 zero-padded to (128, 128) bf16 so the MXU gets a full tile;
    # only the first 2 columns are live.  Slice before the (TM, 2) store so the HBM
    # writeback stays narrow (8 B/row).
    logits = jnp.dot(h.astype(jnp.bfloat16), w5_ref[...],
                     preferred_element_type=jnp.float32)
    o_ref[...] = logits[:, :o_ref.shape[-1]] + b5_ref[...]


def prepare_params(params):
    """One-time weight prep, hoisted out of the per-call (jitted) path:
    bf16 casts for the MXU layers and lane-dense zero-padding of the output layer."""
    (w1, b1), (w2, b2), (w3, b3), (w4, b4), (w5, b5) = params
    hidden = w2.shape[0]                                    # 128
    w5p = jnp.zeros((hidden, 128), jnp.float32).at[:, :w5.shape[1]].set(w5)
    return (w1.astype(jnp.float32), b1.astype(jnp.float32),
            w2.astype(jnp.bfloat16), b2.astype(jnp.float32),
            w3.astype(jnp.bfloat16), b3.astype(jnp.float32),
            w4.astype(jnp.bfloat16), b4.astype(jnp.float32),
            w5p.astype(jnp.bfloat16), b5.astype(jnp.float32))


def _choose_tm(batch):
    """Batch-tile policy from the perf review."""
    if batch <= 1024:
        return max(8, ((batch + 7) // 8) * 8)   # single grid step, no padding tax
    if batch <= 4096:
        return 1024                              # >= 2 steps => both v7x TCs busy
    return 2048                                  # multiple of 256 (whole v6e MXU passes)


@jax.jit
def my_network_forward(x, prepared):
    """x: (B, 3) float32.  prepared: output of prepare_params()."""
    B = x.shape[0]
    tm = _choose_tm(B)
    B_pad = pl.cdiv(B, tm) * tm
    if B_pad != B:
        x = jnp.pad(x, ((0, B_pad - B), (0, 0)))

    out_dim = prepared[-1].shape[-1]             # 2
    grid = (B_pad // tm,)

    def resident(arr):
        # Whole-array block + constant index_map => stays resident in VMEM across steps.
        return pl.BlockSpec(arr.shape, lambda i: (0,) * arr.ndim)

    in_specs = [pl.BlockSpec((tm, x.shape[1]), lambda i: (i, 0))] + \
               [resident(a) for a in prepared]

    out = pl.pallas_call(
        _mlp_kernel,
        out_shape=jax.ShapeDtypeStruct((B_pad, out_dim), jnp.float32),
        grid=grid,
        in_specs=in_specs,
        out_specs=pl.BlockSpec((tm, out_dim), lambda i: (i, 0)),
        compiler_params=pltpu.CompilerParams(
            dimension_semantics=("parallel",)),
    )(x, *prepared)

    return out[:B]


def init_params(key):
    """Deterministic PyTorch-style (Kaiming-uniform-ish) init for the 5 Linear layers."""
    dims = [(3, 128), (128, 128), (128, 128), (128, 128), (128, 2)]
    params = []
    for (fan_in, fan_out) in dims:
        kw, kb, key = jax.random.split(key, 3)
        bound = 1.0 / jnp.sqrt(jnp.asarray(fan_in, jnp.float32))
        w = jax.random.uniform(kw, (fan_in, fan_out), jnp.float32, -bound, bound)
        b = jax.random.uniform(kb, (1, fan_out), jnp.float32, -bound, bound)
        params.append((w, b))
    return params


def reference_forward_bf16(x, params):
    """Reference mirroring the kernel's numerics (f32 layer-1, bf16 MXU layers)."""
    w1, b1 = params[0]
    h = jnp.maximum(x @ w1 + b1, 0.0)
    for (w, b) in params[1:-1]:
        h = jnp.dot(h.astype(jnp.bfloat16), w.astype(jnp.bfloat16),
                    preferred_element_type=jnp.float32) + b
        h = jnp.maximum(h, 0.0)
    w, b = params[-1]
    return jnp.dot(h.astype(jnp.bfloat16), w.astype(jnp.bfloat16),
                   preferred_element_type=jnp.float32) + b


def reference_forward_f32(x, params):
    h = x
    for (w, b) in params[:-1]:
        h = jnp.maximum(h @ w + b, 0.0)
    w, b = params[-1]
    return h @ w + b


if __name__ == "__main__":
    key = jax.random.PRNGKey(0)
    kx, kp = jax.random.split(key)

    params = init_params(kp)
    prepared = prepare_params(params)          # hoisted weight prep (once, not per call)

    # 300 -> single-step path (TM=304, no padding tax); 2048 -> 2-step gridded path.
    for batch in (300, 2048):
        x = jax.random.normal(jax.random.fold_in(kx, batch), (batch, 3),
                              dtype=jnp.float32)
        out = jax.block_until_ready(my_network_forward(x, prepared))
        assert out.shape == (batch, 2), out.shape

        ref_bf16 = reference_forward_bf16(x, params)
        assert jnp.allclose(out, ref_bf16, atol=2e-3, rtol=2e-3), \
            f"batch={batch}: mismatch vs bf16-matched JAX reference"

        ref_f32 = reference_forward_f32(x, params)
        assert jnp.allclose(out, ref_f32, atol=5e-2, rtol=5e-2), \
            f"batch={batch}: mismatch vs float32 JAX reference"

    print("KERNEL_OK")
</pallas_src>

<mosaic_0001>
module attributes {stable_mosaic.version = 11 : i64} {
  func.func @_mlp_kernel(%arg0: i32, %arg1: memref<304x3xf32, #tpu.memory_space<vmem>>, %arg2: memref<3x128xf32, #tpu.memory_space<vmem>>, %arg3: memref<1x128xf32, #tpu.memory_space<vmem>>, %arg4: memref<128x128xbf16, #tpu.memory_space<vmem>>, %arg5: memref<1x128xf32, #tpu.memory_space<vmem>>, %arg6: memref<128x128xbf16, #tpu.memory_space<vmem>>, %arg7: memref<1x128xf32, #tpu.memory_space<vmem>>, %arg8: memref<128x128xbf16, #tpu.memory_space<vmem>>, %arg9: memref<1x128xf32, #tpu.memory_space<vmem>>, %arg10: memref<128x128xbf16, #tpu.memory_space<vmem>>, %arg11: memref<1x2xf32, #tpu.memory_space<vmem>>, %arg12: memref<304x2xf32, #tpu.memory_space<vmem>>) attributes {dimension_semantics = [#tpu.dimension_semantics<parallel>], iteration_bounds = array<i64: 1>, scalar_prefetch = 0 : i64, scratch_operands = 0 : i64, tpu.core_type = #tpu.core_type<tc>, window_params = [{transform_indices = @transform_0, window_bounds = array<i64: 304, 3>}, {pipeline_mode = #tpu.pipeline_mode<synchronous>, transform_indices = @transform_1, window_bounds = array<i64: 3, 128>}, {pipeline_mode = #tpu.pipeline_mode<synchronous>, transform_indices = @transform_2, window_bounds = array<i64: 1, 128>}, {pipeline_mode = #tpu.pipeline_mode<synchronous>, transform_indices = @transform_3, window_bounds = array<i64: 128, 128>}, {pipeline_mode = #tpu.pipeline_mode<synchronous>, transform_indices = @transform_4, window_bounds = array<i64: 1, 128>}, {pipeline_mode = #tpu.pipeline_mode<synchronous>, transform_indices = @transform_5, window_bounds = array<i64: 128, 128>}, {pipeline_mode = #tpu.pipeline_mode<synchronous>, transform_indices = @transform_6, window_bounds = array<i64: 1, 128>}, {pipeline_mode = #tpu.pipeline_mode<synchronous>, transform_indices = @transform_7, window_bounds = array<i64: 128, 128>}, {pipeline_mode = #tpu.pipeline_mode<synchronous>, transform_indices = @transform_8, window_bounds = array<i64: 1, 128>}, {pipeline_mode = #tpu.pipeline_mode<synchronous>, transform_indices = @transform_9, window_bounds = array<i64: 128, 128>}, {pipeline_mode = #tpu.pipeline_mode<synchronous>, transform_indices = @transform_10, window_bounds = array<i64: 1, 2>}, {transform_indices = @transform_11, window_bounds = array<i64: 304, 2>}]} {
    %c0 = arith.constant 0 : index
    %c0_0 = arith.constant 0 : index
    %0 = vector.load %arg1[%c0, %c0_0] : memref<304x3xf32, #tpu.memory_space<vmem>>, vector<304x3xf32>
    %c0_1 = arith.constant 0 : index
    %c0_2 = arith.constant 0 : index
    %1 = vector.load %arg2[%c0_1, %c0_2] : memref<3x128xf32, #tpu.memory_space<vmem>>, vector<3x128xf32>
    %2 = vector.extract_strided_slice %0 {offsets = [0, 0], sizes = [304, 1], strides = [1, 1]} : vector<304x3xf32> to vector<304x1xf32>
    %3 = vector.extract_strided_slice %1 {offsets = [0, 0], sizes = [1, 128], strides = [1, 1]} : vector<3x128xf32> to vector<1x128xf32>
    %4 = vector.broadcast %2 : vector<304x1xf32> to vector<304x128xf32>
    %5 = vector.broadcast %3 : vector<1x128xf32> to vector<304x128xf32>
    %6 = arith.mulf %4, %5 : vector<304x128xf32>
    %7 = vector.extract_strided_slice %0 {offsets = [0, 1], sizes = [304, 1], strides = [1, 1]} : vector<304x3xf32> to vector<304x1xf32>
    %8 = vector.extract_strided_slice %1 {offsets = [1, 0], sizes = [1, 128], strides = [1, 1]} : vector<3x128xf32> to vector<1x128xf32>
    %9 = vector.broadcast %7 : vector<304x1xf32> to vector<304x128xf32>
    %10 = vector.broadcast %8 : vector<1x128xf32> to vector<304x128xf32>
    %11 = arith.mulf %9, %10 : vector<304x128xf32>
    %12 = arith.addf %6, %11 : vector<304x128xf32>
    %13 = vector.extract_strided_slice %0 {offsets = [0, 2], sizes = [304, 1], strides = [1, 1]} : vector<304x3xf32> to vector<304x1xf32>
    %14 = vector.extract_strided_slice %1 {offsets = [2, 0], sizes = [1, 128], strides = [1, 1]} : vector<3x128xf32> to vector<1x128xf32>
    %15 = vector.broadcast %13 : vector<304x1xf32> to vector<304x128xf32>
    %16 = vector.broadcast %14 : vector<1x128xf32> to vector<304x128xf32>
    %17 = arith.mulf %15, %16 : vector<304x128xf32>
    %18 = arith.addf %12, %17 : vector<304x128xf32>
    %c0_3 = arith.constant 0 : index
    %c0_4 = arith.constant 0 : index
    %19 = vector.load %arg3[%c0_3, %c0_4] : memref<1x128xf32, #tpu.memory_space<vmem>>, vector<1x128xf32>
    %20 = vector.broadcast %19 : vector<1x128xf32> to vector<304x128xf32>
    %21 = arith.addf %18, %20 : vector<304x128xf32>
    %cst = arith.constant 0.000000e+00 : f32
    %22 = vector.broadcast %cst : f32 to vector<304x128xf32>
    %23 = arith.maximumf %21, %22 : vector<304x128xf32>
    %24 = arith.truncf %23 : vector<304x128xf32> to vector<304x128xbf16>
    %c0_5 = arith.constant 0 : index
    %c0_6 = arith.constant 0 : index
    %25 = vector.load %arg4[%c0_5, %c0_6] : memref<128x128xbf16, #tpu.memory_space<vmem>>, vector<128x128xbf16>
    %cst_7 = arith.constant dense<0.000000e+00> : vector<304x128xf32>
    %26 = tpu.matmul %24, %25, %cst_7 {dimension_numbers = #tpu.dot_dimension_numbers<[1], [0], [0], [1], [0, 0, 1, 1], [], []>} : vector<304x128xbf16>, vector<128x128xbf16>, vector<304x128xf32> -> vector<304x128xf32>
    %c0_8 = arith.constant 0 : index
    %c0_9 = arith.constant 0 : index
    %27 = vector.load %arg5[%c0_8, %c0_9] : memref<1x128xf32, #tpu.memory_space<vmem>>, vector<1x128xf32>
    %28 = vector.broadcast %27 : vector<1x128xf32> to vector<304x128xf32>
    %29 = arith.addf %26, %28 : vector<304x128xf32>
    %cst_10 = arith.constant 0.000000e+00 : f32
    %30 = vector.broadcast %cst_10 : f32 to vector<304x128xf32>
    %31 = arith.maximumf %29, %30 : vector<304x128xf32>
    %32 = arith.truncf %31 : vector<304x128xf32> to vector<304x128xbf16>
    %c0_11 = arith.constant 0 : index
    %c0_12 = arith.constant 0 : index
    %33 = vector.load %arg6[%c0_11, %c0_12] : memref<128x128xbf16, #tpu.memory_space<vmem>>, vector<128x128xbf16>
    %cst_13 = arith.constant dense<0.000000e+00> : vector<304x128xf32>
    %34 = tpu.matmul %32, %33, %cst_13 {dimension_numbers = #tpu.dot_dimension_numbers<[1], [0], [0], [1], [0, 0, 1, 1], [], []>} : vector<304x128xbf16>, vector<128x128xbf16>, vector<304x128xf32> -> vector<304x128xf32>
    %c0_14 = arith.constant 0 : index
    %c0_15 = arith.constant 0 : index
    %35 = vector.load %arg7[%c0_14, %c0_15] : memref<1x128xf32, #tpu.memory_space<vmem>>, vector<1x128xf32>
    %36 = vector.broadcast %35 : vector<1x128xf32> to vector<304x128xf32>
    %37 = arith.addf %34, %36 : vector<304x128xf32>
    %cst_16 = arith.constant 0.000000e+00 : f32
    %38 = vector.broadcast %cst_16 : f32 to vector<304x128xf32>
    %39 = arith.maximumf %37, %38 : vector<304x128xf32>
    %40 = arith.truncf %39 : vector<304x128xf32> to vector<304x128xbf16>
    %c0_17 = arith.constant 0 : index
    %c0_18 = arith.constant 0 : index
    %41 = vector.load %arg8[%c0_17, %c0_18] : memref<128x128xbf16, #tpu.memory_space<vmem>>, vector<128x128xbf16>
    %cst_19 = arith.constant dense<0.000000e+00> : vector<304x128xf32>
    %42 = tpu.matmul %40, %41, %cst_19 {dimension_numbers = #tpu.dot_dimension_numbers<[1], [0], [0], [1], [0, 0, 1, 1], [], []>} : vector<304x128xbf16>, vector<128x128xbf16>, vector<304x128xf32> -> vector<304x128xf32>
    %c0_20 = arith.constant 0 : index
    %c0_21 = arith.constant 0 : index
    %43 = vector.load %arg9[%c0_20, %c0_21] : memref<1x128xf32, #tpu.memory_space<vmem>>, vector<1x128xf32>
    %44 = vector.broadcast %43 : vector<1x128xf32> to vector<304x128xf32>
    %45 = arith.addf %42, %44 : vector<304x128xf32>
    %cst_22 = arith.constant 0.000000e+00 : f32
    %46 = vector.broadcast %cst_22 : f32 to vector<304x128xf32>
    %47 = arith.maximumf %45, %46 : vector<304x128xf32>
    %48 = arith.truncf %47 : vector<304x128xf32> to vector<304x128xbf16>
    %c0_23 = arith.constant 0 : index
    %c0_24 = arith.constant 0 : index
    %49 = vector.load %arg10[%c0_23, %c0_24] : memref<128x128xbf16, #tpu.memory_space<vmem>>, vector<128x128xbf16>
    %cst_25 = arith.constant dense<0.000000e+00> : vector<304x128xf32>
    %50 = tpu.matmul %48, %49, %cst_25 {dimension_numbers = #tpu.dot_dimension_numbers<[1], [0], [0], [1], [0, 0, 1, 1], [], []>} : vector<304x128xbf16>, vector<128x128xbf16>, vector<304x128xf32> -> vector<304x128xf32>
    %51 = vector.extract_strided_slice %50 {offsets = [0, 0], sizes = [304, 2], strides = [1, 1]} : vector<304x128xf32> to vector<304x2xf32>
    %c0_26 = arith.constant 0 : index
    %c0_27 = arith.constant 0 : index
    %52 = vector.load %arg11[%c0_26, %c0_27] : memref<1x2xf32, #tpu.memory_space<vmem>>, vector<1x2xf32>
    %53 = vector.broadcast %52 : vector<1x2xf32> to vector<304x2xf32>
    %54 = arith.addf %51, %53 : vector<304x2xf32>
    %c0_28 = arith.constant 0 : index
    %c0_29 = arith.constant 0 : index
    %55 = vector.load %arg12[%c0_28, %c0_29] : memref<304x2xf32, #tpu.memory_space<vmem>>, vector<304x2xf32>
    tpu.vector_store %arg12[%c0_28, %c0_29], %54 {strides = array<i32>} : memref<304x2xf32, #tpu.memory_space<vmem>>, vector<304x2xf32>,
    return
  }
  func.func @transform_0(%arg0: i32) -> (i32, i32) {
    %c0_i32 = arith.constant 0 : i32
    %c0_i32_0 = arith.constant 0 : i32
    return %arg0, %c0_i32 : i32, i32
  }
  func.func @transform_1(%arg0: i32) -> (i32, i32) {
    %c0_i32 = arith.constant 0 : i32
    %c0_i32_0 = arith.constant 0 : i32
    %c0_i32_1 = arith.constant 0 : i32
    return %c0_i32, %c0_i32_0 : i32, i32
  }
  func.func @transform_2(%arg0: i32) -> (i32, i32) {
    %c0_i32 = arith.constant 0 : i32
    %c0_i32_0 = arith.constant 0 : i32
    %c0_i32_1 = arith.constant 0 : i32
    return %c0_i32, %c0_i32_0 : i32, i32
  }
  func.func @transform_3(%arg0: i32) -> (i32, i32) {
    %c0_i32 = arith.constant 0 : i32
    %c0_i32_0 = arith.constant 0 : i32
    %c0_i32_1 = arith.constant 0 : i32
    return %c0_i32, %c0_i32_0 : i32, i32
  }
  func.func @transform_4(%arg0: i32) -> (i32, i32) {
    %c0_i32 = arith.constant 0 : i32
    %c0_i32_0 = arith.constant 0 : i32
    %c0_i32_1 = arith.constant 0 : i32
    return %c0_i32, %c0_i32_0 : i32, i32
  }
  func.func @transform_5(%arg0: i32) -> (i32, i32) {
    %c0_i32 = arith.constant 0 : i32
    %c0_i32_0 = arith.constant 0 : i32
    %c0_i32_1 = arith.constant 0 : i32
    return %c0_i32, %c0_i32_0 : i32, i32
  }
  func.func @transform_6(%arg0: i32) -> (i32, i32) {
    %c0_i32 = arith.constant 0 : i32
    %c0_i32_0 = arith.constant 0 : i32
    %c0_i32_1 = arith.constant 0 : i32
    return %c0_i32, %c0_i32_0 : i32, i32
  }
  func.func @transform_7(%arg0: i32) -> (i32, i32) {
    %c0_i32 = arith.constant 0 : i32
    %c0_i32_0 = arith.constant 0 : i32
    %c0_i32_1 = arith.constant 0 : i32
    return %c0_i32, %c0_i32_0 : i32, i32
  }
  func.func @transform_8(%arg0: i32) -> (i32, i32) {
    %c0_i32 = arith.constant 0 : i32
    %c0_i32_0 = arith.constant 0 : i32
    %c0_i32_1 = arith.constant 0 : i32
    return %c0_i32, %c0_i32_0 : i32, i32
  }
  func.func @transform_9(%arg0: i32) -> (i32, i32) {
    %c0_i32 = arith.constant 0 : i32
    %c0_i32_0 = arith.constant 0 : i32
    %c0_i32_1 = arith.constant 0 : i32
    return %c0_i32, %c0_i32_0 : i32, i32
  }
  func.func @transform_10(%arg0: i32) -> (i32, i32) {
    %c0_i32 = arith.constant 0 : i32
    %c0_i32_0 = arith.constant 0 : i32
    %c0_i32_1 = arith.constant 0 : i32
    return %c0_i32, %c0_i32_0 : i32, i32
  }
  func.func @transform_11(%arg0: i32) -> (i32, i32) {
    %c0_i32 = arith.constant 0 : i32
    %c0_i32_0 = arith.constant 0 : i32
    return %arg0, %c0_i32 : i32, i32
  }
}

</mosaic_0001>

<bundles_post_ra>
// kernel: my_network_forward.1
= control target key start
LH: loop header
LB: loop body
LE: loop exit
PB: predicated region body
PF: predicated region fallthrough
CT: control target
= control target key end

     0   :  { %v2768_v0 = vmov 1   ;;  %v2769_v1 = vmov 0   ;;  %v2770_v4 = vmov 0.0   ;;  %v2771_v7 = vmov 2   ;;  %s3945_s0 = inlined_call_operand.vmem [shape: f32[304,3], index: 0, kind: input, shape index: {}]   ;;  %s3946_s3 = inlined_call_operand.vmem [shape: bf16[128,128], index: 3, kind: input, shape index: {}]   ;;  %s3947_s1 = inlined_call_operand.vmem [shape: f32[3,128], index: 1, kind: input, shape index: {}]   ;;  %s3948_s2 = inlined_call_operand.vmem [shape: f32[1,128], index: 2, kind: input, shape index: {}]   ;;  %s3949_s5 = inlined_call_operand.vmem [shape: bf16[128,128], index: 5, kind: input, shape index: {}]   ;;  %s3950_s4 = inlined_call_operand.vmem [shape: f32[1,128], index: 4, kind: input, shape index: {}]   ;;  %s3951_s7 = inlined_call_operand.vmem [shape: bf16[128,128], index: 7, kind: input, shape index: {}]   ;;  %s3952_s6 = inlined_call_operand.vmem [shape: f32[1,128], index: 6, kind: input, shape index: {}]   ;;  %s3953_s9 = inlined_call_operand.vmem [shape: bf16[128,128], index: 9, kind: input, shape index: {}]   ;;  %s3954_s8 = inlined_call_operand.vmem [shape: f32[1,128], index: 8, kind: input, shape index: {}]   ;;  %s3955_s10 = inlined_call_operand.vmem [shape: f32[1,2], index: 10, kind: input, shape index: {}]   ;;  %s3956_s11 = inlined_call_operand.vmem [shape: f32[304,2], index: 11, kind: output, shape index: {}]  }
   0x1   :  { %2671 = vset.pattern.permute.xlu1 %v2768_v0  ;;  %2670 = vset.pattern.permute.xlu0 %v2769_v1  ;;  %v39_v2 = vld [vmem:[%s3945_s0] sm:$0xff]  ;;  %v40_v3 = vld [vmem:[%s3945_s0 + $0x8] sm:$0xff]  ;;  %v41_v8 = vld [vmem:[%s3945_s0 + $0x10] sm:$0xff]  ;;  %vm2772_vm0 = vmmov 0   ;;  %v268_v39 = vlaneseq  ;;  %vm2109_vm1 = vcmask 15360  }
   0x2   :  { %311 = vperm.xlu1 %2671, %v39_v2   ;;  %80 = vperm.xlu0 %2670, %v39_v2   ;;  %v2734_v5 = vld [vmem:[%s3946_s3] sm:$0xff]   ;;  %v2735_v6 = vld [vmem:[%s3946_s3 + $0x8] sm:$0xff]   ;;  %v2736_v9 = vld [vmem:[%s3946_s3 + $0x10] sm:$0xff]  }
   0x3   :  { %2297 = vmatprep.subr.bf16.mxu0 %v2770_v4  ;;  %2389 = vmatprep.subr.bf16.mxu1 %v2770_v4  ;;  %v43_v10 = vld [vmem:[%s3945_s0 + $0x20] sm:$0xff]  ;;  %v2737_v11 = vld [vmem:[%s3946_s3 + $0x18] sm:$0xff]   ;;  %v45_v12 = vld [vmem:[%s3945_s0 + $0x30] sm:$0xff]  ;;  %v269_v40 = vshrl.u32 %v268_v39, 7 }
   0x4   :  { %2298 = vmatpush3.bf16.msra.mxu0 %v2734_v5  ;;  %2313 = vmatprep.mubr.msk.bf16.mxu0 %vm2772_vm0, %v2770_v4  ;;  %v2738_v13 = vld [vmem:[%s3946_s3 + $0x20] sm:$0xff]   ;;  %v42_v14 = vld [vmem:[%s3945_s0 + $0x18] sm:$0xff]  ;;  %v2739_v16 = vld [vmem:[%s3946_s3 + $0x28] sm:$0xff]  }
   0x5   :  { %2299 = vmatprep.subr.bf16.mxu0 %v2770_v4  ;;  %2405 = vmatprep.mubr.msk.bf16.mxu1 %vm2772_vm0, %v2770_v4  ;;  %v47_v15 = vld [vmem:[%s3945_s0 + $0x40] sm:$0xff]  ;;  %v2892_v17 = vld [vmem:[%s3945_s0 + $0x50] sm:$0xff]  ;;  %v2741_v19 = vld [vmem:[%s3946_s3 + $0x38] sm:$0xff]   ;;  %v464_v42 = vsub.s32 1, %v269_v40  ;;  %v270_v43 = vsub.s32 0, %v269_v40  ;;  %v696_v48 = vsub.s32 2, %v269_v40 }
   0x6   :  { %315 = vperm.xlu1 %2671, %v40_v3   ;;  %85 = vperm.xlu0 %2670, %v40_v3   ;;  %v2740_v18 = vld [vmem:[%s3946_s3 + $0x30] sm:$0xff]   ;;  %v44_v20 = vld [vmem:[%s3945_s0 + $0x28] sm:$0xff]  ;;  %v46_v21 = vld [vmem:[%s3945_s0 + $0x38] sm:$0xff] }
   0x7   :  { %v48_v22 = vld [vmem:[%s3945_s0 + $0x48] sm:$0xff]  ;;  %v50_v23 = vld [vmem:[%s3945_s0 + $0x58] sm:$0xff]  ;;  %v51_v29 = vld [vmem:[%s3945_s0 + $0x60] sm:$0xff] }
   0x8   :  { %2300 = vmatpush3.bf16.msra.mxu0 %v2735_v6  ;;  %v52_v24 = vld [vmem:[%s3945_s0 + $0x68] sm:$0xff]  ;;  %v2928_v25 = vld [vmem:[%s3945_s0 + $0x78] sm:$0xff]  ;;  %v2960_v30 = vld [vmem:[%s3945_s0 + $0x70] sm:$0xff] }
   0x9   :  { %2301 = vmatprep.subr.bf16.mxu0 %v2770_v4  ;;  %v2935_v26 = vld [vmem:[%s3945_s0 + $0x88] sm:$0xff]  ;;  %v2941_v27 = vld [vmem:[%s3945_s0 + $0x98] sm:$0xff]  ;;  %v2966_v31 = vld [vmem:[%s3945_s0 + $0x80] sm:$0xff] }
   0xa   :  { %2673 = vset.pattern.permute.xlu1 %v2771_v7  ;;  %2672 = vset.pattern.permute.xlu0 %v2771_v7  ;;  %v2948_v28 = vld [vmem:[%s3945_s0 + $0xa8] sm:$0xff]  ;;  %v2973_v32 = vld [vmem:[%s3945_s0 + $0x90] sm:$0xff]  ;;  %v2981_v33 = vld [vmem:[%s3945_s0 + $0xa0] sm:$0xff] }
   0xb   :  { %547 = vperm.xlu1 %2673, %v40_v3   ;;  %543 = vperm.xlu0 %2672, %v39_v2   ;;  %v2987_v34 = vld [vmem:[%s3945_s0 + $0xb0] sm:$0xff]  ;;  %v2995_v35 = vld [vmem:[%s3945_s0 + $0xc0] sm:$0xff]  ;;  %v3008_v37 = vld [vmem:[%s3945_s0 + $0xb8] sm:$0xff] }
   0xc   :  { %2302 = vmatpush3.bf16.msra.mxu0 %v2736_v9  ;;  %v3001_v36 = vld [vmem:[%s3945_s0 + $0xd0] sm:$0xff]  ;;  %v3016_v38 = vld [vmem:[%s3945_s0 + $0xc8] sm:$0xff]  ;;  %v3024_v41 = vld [vmem:[%s3945_s0 + $0xd8] sm:$0xff] }
   0xd   :  { %2303 = vmatprep.subr.bf16.mxu0 %v2770_v4  ;;  %v77_v44 = vld [vmem:[%s3947_s1] sm:$0x7]  ;;  %v3033_v45 = vld [vmem:[%s3945_s0 + $0xe8] sm:$0xff]  ;;  %v3045_v51 = vld [vmem:[%s3945_s0 + $0xf8] sm:$0xff] }
   0xe   :  { %v3038_v49 = vrot.slane %v77_v44, %v464_v42  ;;  %v3040_v50 = vrot.slane %v77_v44, %v270_v43  ;;  %v3049_v54 = vrot.slane %v77_v44, %v696_v48  ;;  %v3059_v59 = vld [vmem:[%s3945_s0 + $0x108] sm:$0xff]  ;;  %v3068_v5 = vld [vmem:[%s3948_s2] ss:$0 sm:$0xff] }
   0xf   :  { %2674 = vset.pattern.permute.xlu1 %v2769_v1  ;;  %551 = vperm.xlu0 %2672, %v41_v8   ;;  %v3073_v9 = vld [vmem:[%s3945_s0 + $0xe0] sm:$0xff] }
  0x10   :  { %90 = vperm.xlu1 %2674, %v41_v8   ;;  %2304 = vmatpush3.bf16.msra.mxu0 %v2737_v11 }
  0x11   :  { %2305 = vmatprep.subr.bf16.mxu0 %v2770_v4 }
  0x13   :  { %559 = vperm.xlu0 %2672, %v43_v10  }
  0x14   :  { %2675 = vset.pattern.permute.xlu1 %v2768_v0  ;;  %2306 = vmatpush3.bf16.msra.mxu0 %v2738_v13 }
  0x15   :  { %319 = vperm.xlu1 %2675, %v41_v8   ;;  %2307 = vmatprep.subr.bf16.mxu0 %v2770_v4 }
  0x17   :  { %567 = vperm.xlu0 %2672, %v45_v12  }
  0x18   :  { %2308 = vmatpush3.bf16.msra.mxu0 %v2739_v16 }
  0x19   :  { %323 = vperm.xlu1 %2675, %v42_v14   ;;  %2309 = vmatprep.subr.bf16.mxu0 %v2770_v4 }
  0x1b   :  { %575 = vperm.xlu0 %2672, %v47_v15  }
  0x1c   :  { %2310 = vmatpush3.bf16.msra.mxu0 %v2740_v18 }
  0x1d   :  { %2676 = vset.pattern.permute.xlu1 %v2771_v7  ;;  %2311 = vmatprep.subr.bf16.mxu0 %v2770_v4 }
  0x1e   :  { %555 = vperm.xlu1 %2676, %v42_v14  }
  0x1f   :  { %583 = vperm.xlu0 %2672, %v2892_v17  }
  0x20   :  { %2312 = vmatpush3.bf16.msra.mxu0 %v2741_v19 }
  0x21   :  { %2481 = vmatprep.subr.bf16.mxu0 %v2770_v4 }
  0x22   :  { %2677 = vset.pattern.permute.xlu1 %v2769_v1 }
  0x23   :  { %100 = vperm.xlu1 %2677, %v43_v10   ;;  %2688 = vset.pattern.permute.xlu0 %v2769_v1 }
  0x24   :  { %95 = vperm.xlu0 %2688, %v42_v14  }
  0x27   :  { %2678 = vset.pattern.permute.xlu1 %v2768_v0 }
  0x28   :  { %327 = vperm.xlu1 %2678, %v43_v10   ;;  %105 = vperm.xlu0 %2688, %v44_v20  }
  0x2c   :  { %331 = vperm.xlu1 %2678, %v44_v20   ;;  %115 = vperm.xlu0 %2688, %v46_v21  }
  0x30   :  { %2679 = vset.pattern.permute.xlu1 %v2771_v7  ;;  %125 = vperm.xlu0 %2688, %v48_v22  }
  0x31   :  { %563 = vperm.xlu1 %2679, %v44_v20  }
  0x34   :  { %135 = vperm.xlu0 %2688, %v50_v23  }
  0x35   :  { %2680 = vset.pattern.permute.xlu1 %v2769_v1 }
  0x36   :  { %110 = vperm.xlu1 %2680, %v45_v12  }
  0x38   :  { %145 = vperm.xlu0 %2688, %v52_v24  }
  0x3a   :  { %2681 = vset.pattern.permute.xlu1 %v2768_v0 }
  0x3b   :  { %335 = vperm.xlu1 %2681, %v45_v12  }
  0x3c   :  { %155 = vperm.xlu0 %2688, %v2928_v25  }
  0x3f   :  { %339 = vperm.xlu1 %2681, %v46_v21  }
  0x40   :  { %165 = vperm.xlu0 %2688, %v2935_v26  }
  0x43   :  { %2682 = vset.pattern.permute.xlu1 %v2771_v7 }
  0x44   :  { %571 = vperm.xlu1 %2682, %v46_v21   ;;  %175 = vperm.xlu0 %2688, %v2941_v27   ;;  %v3091_v21 = vld [vmem:[%s3945_s0 + $0xf0] sm:$0xff] }
  0x48   :  { %2683 = vset.pattern.permute.xlu1 %v2769_v1  ;;  %185 = vperm.xlu0 %2688, %v2948_v28  }
  0x49   :  { %120 = vperm.xlu1 %2683, %v47_v15  }
  0x4c   :  { %2703 = vset.pattern.permute.xlu0 %v2771_v7 }
  0x4d   :  { %2684 = vset.pattern.permute.xlu1 %v2768_v0  ;;  %591 = vperm.xlu0 %2703, %v51_v29  }
  0x4e   :  { %343 = vperm.xlu1 %2684, %v47_v15  }
  0x51   :  { %599 = vperm.xlu0 %2703, %v2960_v30  }
  0x52   :  { %347 = vperm.xlu1 %2684, %v48_v22  }
  0x55   :  { %607 = vperm.xlu0 %2703, %v2966_v31  }
  0x56   :  { %2685 = vset.pattern.permute.xlu1 %v2771_v7 }
  0x57   :  { %579 = vperm.xlu1 %2685, %v48_v22  }
  0x59   :  { %615 = vperm.xlu0 %2703, %v2973_v32  }
  0x5b   :  { %2686 = vset.pattern.permute.xlu1 %v2769_v1 }
  0x5c   :  { %130 = vperm.xlu1 %2686, %v2892_v17  }
  0x5d   :  { %623 = vperm.xlu0 %2703, %v2981_v33  }
  0x60   :  { %2687 = vset.pattern.permute.xlu1 %v2768_v0 }
  0x61   :  { %351 = vperm.xlu1 %2687, %v2892_v17   ;;  %631 = vperm.xlu0 %2703, %v2987_v34  }
  0x65   :  { %355 = vperm.xlu1 %2687, %v50_v23   ;;  %639 = vperm.xlu0 %2703, %v2995_v35  }
  0x69   :  { %2689 = vset.pattern.permute.xlu1 %v2771_v7  ;;  %647 = vperm.xlu0 %2703, %v3001_v36  }
  0x6a   :  { %587 = vperm.xlu1 %2689, %v50_v23  }
  0x6d   :  { %2714 = vset.pattern.permute.xlu0 %v2769_v1 }
  0x6e   :  { %2690 = vset.pattern.permute.xlu1 %v2769_v1  ;;  %195 = vperm.xlu0 %2714, %v3008_v37  }
  0x6f   :  { %140 = vperm.xlu1 %2690, %v51_v29  }
  0x72   :  { %205 = vperm.xlu0 %2714, %v3016_v38  }
  0x73   :  { %2691 = vset.pattern.permute.xlu1 %v2768_v0 }
  0x74   :  { %359 = vperm.xlu1 %2691, %v51_v29  }
  0x76   :  { %215 = vperm.xlu0 %2714, %v3024_v41  }
  0x78   :  { %363 = vperm.xlu1 %2691, %v52_v24  }
  0x7a   :  { %225 = vperm.xlu0 %2714, %v3033_v45  }
  0x7c   :  { %2692 = vset.pattern.permute.xlu1 %v2771_v7 }
  0x7d   :  { %595 = vperm.xlu1 %2692, %v52_v24  }
  0x7e   :  { %235 = vperm.xlu0 %2714, %v3045_v51  }
  0x81   :  { %2693 = vset.pattern.permute.xlu1 %v2769_v1  ;;  %v312_v46 = vpop.permute.xlu1 %311  ;;  %v81_v47 = vpop.permute.xlu0 %80 }
  0x82   :  { %150 = vperm.xlu1 %2693, %v2960_v30   ;;  %v466_v55 = vmul.f32 %v3038_v49, %v312_v46  ;;  %v272_v56 = vmul.f32 %v3040_v50, %v81_v47  ;;  %245 = vperm.xlu0 %2714, %v3059_v59  }
  0x84   :  { %v504_v62 = vadd.f32 %v466_v55, %v272_v56 }
  0x85   :  { %v316_v52 = vpop.permute.xlu1 %315  ;;  %v86_v53 = vpop.permute.xlu0 %85 }
  0x86   :  { %2694 = vset.pattern.permute.xlu1 %v2768_v0  ;;  %v467_v57 = vmul.f32 %v3038_v49, %v316_v52  ;;  %v273_v58 = vmul.f32 %v3040_v50, %v86_v53  ;;  %2723 = vset.pattern.permute.xlu0 %v2771_v7 }
  0x87   :  { %367 = vperm.xlu1 %2694, %v2960_v30   ;;  %655 = vperm.xlu0 %2723, %v3073_v9  }
  0x88   :  { %v505_v63 = vadd.f32 %v467_v57, %v273_v58 }
  0x8a   :  { %v548_v60 = vpop.permute.xlu1 %547  ;;  %v544_v61 = vpop.permute.xlu0 %543 }
  0x8b   :  { %v699_v2 = vmul.f32 %v3049_v54, %v548_v60  ;;  %v698_v3 = vmul.f32 %v3049_v54, %v544_v61  ;;  %371 = vperm.xlu1 %2694, %v2928_v25   ;;  %663 = vperm.xlu0 %2723, %v3091_v21  }
  0x8d   :  { %v737_v6 = vadd.f32 %v699_v2, %v505_v63  ;;  %v736_v8 = vadd.f32 %v698_v3, %v504_v62  ;;  %v3119_v2 = vld [vmem:[%s3945_s0 + $0x100] sm:$0xff] }
  0x8e   :  { %v552_v10 = vpop.permute.xlu0 %551 }
  0x8f   :  { %v782_v11 = vadd.f32 %v3068_v5, %v737_v6  ;;  %v781_v12 = vadd.f32 %v3068_v5, %v736_v8  ;;  %2695 = vset.pattern.permute.xlu1 %v2771_v7  ;;  %v91_v13 = vpop.permute.xlu1 %90  ;;  %v700_v30 = vmul.f32 %v3049_v54, %v552_v10  ;;  %671 = vperm.xlu0 %2723, %v3119_v2  }
  0x90   :  { %603 = vperm.xlu1 %2695, %v2928_v25   ;;  %v274_v25 = vmul.f32 %v3040_v50, %v91_v13 }
  0x91   :  { %v819_v14 = vmax.f32 %v781_v12, 0.0  ;;  %v820_v15 = vmax.f32 %v782_v11, 0.0 }
  0x92   :  { %v560_v16 = vpop.permute.xlu0 %559 }
  0x93   :  { %v857_v17 = vpack.c.bf16 %v820_v15, %v819_v14  ;;  %v702_v58 = vmul.f32 %v3049_v54, %v560_v16 }
  0x94   :  { %2696 = vset.pattern.permute.xlu1 %v2769_v1  ;;  %v320_v18 = vpop.permute.xlu1 %319 }
  0x95   :  { %160 = vperm.xlu1 %2696, %v2966_v31   ;;  %2314 = vmatmul.mubr.bf16.vlgmr.msra.gmra.mrb[0].mxu0 %v857_v17  ;;  %v468_v23 = vmul.f32 %v3038_v49, %v320_v18 }
  0x96   :  { %v3083_v19 = vpop.permute.xlu0 %567  ;;  %2317 = vmatprep.mubr.msk.bf16.mxu0 %vm2772_vm0, %v2770_v4 }
  0x97   :  { %v506_v39 = vadd.f32 %v468_v23, %v274_v25 }
  0x98   :  { %v324_v20 = vpop.permute.xlu1 %323 }
  0x99   :  { %2697 = vset.pattern.permute.xlu1 %v2768_v0  ;;  %v738_v42 = vadd.f32 %v700_v30, %v506_v39  ;;  %v469_v43 = vmul.f32 %v3038_v49, %v324_v20 }
  0x9a   :  { %375 = vperm.xlu1 %2697, %v2966_v31   ;;  %v3094_v22 = vpop.permute.xlu0 %575 }
  0x9b   :  { %v783_v55 = vadd.f32 %v3068_v5, %v738_v42 }
  0x9d   :  { %v556_v24 = vpop.permute.xlu1 %555  ;;  %v821_v62 = vmax.f32 %v783_v55, 0.0 }
  0x9e   :  { %379 = vperm.xlu1 %2697, %v2935_v26   ;;  %v3100_v29 = vpop.permute.xlu0 %583  ;;  %v701_v46 = vmul.f32 %v3049_v54, %v556_v24 }
  0xa2   :  { %2698 = vset.pattern.permute.xlu1 %v2771_v7  ;;  %v101_v40 = vpop.permute.xlu1 %100 }
  0xa3   :  { %611 = vperm.xlu1 %2698, %v2935_v26   ;;  %v96_v31 = vpop.permute.xlu0 %95  ;;  %v276_v26 = vmul.f32 %v3040_v50, %v101_v40 }
  0xa4   :  { %v275_v44 = vmul.f32 %v3040_v50, %v96_v31  ;;  %v3145_v31 = vld [vmem:[%s3945_s0 + $0x110] sm:$0xff] }
  0xa5   :  { %679 = vperm.xlu0 %2723, %v3145_v31  }
  0xa6   :  { %v507_v47 = vadd.f32 %v469_v43, %v275_v44 }
  0xa7   :  { %2699 = vset.pattern.permute.xlu1 %v2769_v1  ;;  %v328_v48 = vpop.permute.xlu1 %327  ;;  %v106_v56 = vpop.permute.xlu0 %105 }
  0xa8   :  { %v739_v52 = vadd.f32 %v701_v46, %v507_v47  ;;  %v470_v53 = vmul.f32 %v3038_v49, %v328_v48  ;;  %170 = vperm.xlu1 %2699, %v2973_v32   ;;  %v277_v6 = vmul.f32 %v3040_v50, %v106_v56 }
  0xa9   :  { %2728 = vset.pattern.permute.xlu0 %v2769_v1 }
  0xaa   :  { %v784_v57 = vadd.f32 %v3068_v5, %v739_v52  ;;  %v508_v60 = vadd.f32 %v470_v53, %v276_v26 }
  0xab   :  { %v332_v61 = vpop.permute.xlu1 %331  ;;  %v116_v30 = vpop.permute.xlu0 %115 }
  0xac   :  { %2700 = vset.pattern.permute.xlu1 %v2768_v0  ;;  %v822_v63 = vmax.f32 %v784_v57, 0.0  ;;  %v471_v3 = vmul.f32 %v3038_v49, %v332_v61  ;;  %v740_v10 = vadd.f32 %v702_v58, %v508_v60  ;;  %v279_v43 = vmul.f32 %v3040_v50, %v116_v30  ;;  %v2745_v30 = vld [vmem:[%s3949_s5 + $0x18] sm:$0xff]  }
  0xad   :  { %383 = vperm.xlu1 %2700, %v2973_v32  }
  0xae   :  { %v858_v8 = vpack.c.bf16 %v822_v63, %v821_v62  ;;  %v509_v12 = vadd.f32 %v471_v3, %v277_v6  ;;  %v785_v15 = vadd.f32 %v3068_v5, %v740_v10  ;;  %v2742_v63 = vld [vmem:[%s3949_s5] sm:$0xff]   ;;  %v706_v3 = vmul.f32 %v3049_v54, %v3094_v22  ;;  %v2743_v22 = vld [vmem:[%s3949_s5 + $0x8] sm:$0xff]  }
  0xaf   :  { %v126_v58 = vpop.permute.xlu0 %125  ;;  %2390 = vmatpush3.bf16.msra.mxu1 %v2742_v63 }
  0xb0   :  { %v564_v11 = vpop.permute.xlu1 %563  ;;  %2318 = vmatmul.mubr.bf16.gmra.mrb[4].mxu0 %v858_v8  ;;  %v823_v17 = vmax.f32 %v785_v15, 0.0  ;;  %2391 = vmatprep.subr.bf16.mxu1 %v2770_v4 }
  0xb1   :  { %v703_v13 = vmul.f32 %v3049_v54, %v564_v11  ;;  %387 = vperm.xlu1 %2700, %v2941_v27   ;;  %2321 = vmatprep.mubr.msk.bf16.mxu0 %vm2772_vm0, %v2770_v4  ;;  %v281_v11 = vmul.f32 %v3040_v50, %v126_v58 }
  0xb3   :  { %v741_v14 = vadd.f32 %v703_v13, %v509_v12  ;;  %v3183_v12 = vld [vmem:[%s3945_s0 + $0x128] sm:$0xff]  ;;  %2392 = vmatpush3.bf16.msra.mxu1 %v2743_v22 }
  0xb4   :  { %2393 = vmatprep.subr.bf16.mxu1 %v2770_v4 }
  0xb5   :  { %v786_v16 = vadd.f32 %v3068_v5, %v741_v14  ;;  %2701 = vset.pattern.permute.xlu1 %v2771_v7  ;;  %v111_v32 = vpop.permute.xlu1 %110 }
  0xb6   :  { %619 = vperm.xlu1 %2701, %v2941_v27   ;;  %v278_v25 = vmul.f32 %v3040_v50, %v111_v32  ;;  %v704_v27 = vmul.f32 %v3049_v54, %v3083_v19  ;;  %v2744_v32 = vld [vmem:[%s3949_s5 + $0x10] sm:$0xff]  }
  0xb7   :  { %v824_v18 = vmax.f32 %v786_v16, 0.0  ;;  %2394 = vmatpush3.bf16.msra.mxu1 %v2744_v32 }
  0xb8   :  { %2395 = vmatprep.subr.bf16.mxu1 %v2770_v4 }
  0xb9   :  { %v859_v20 = vpack.c.bf16 %v824_v18, %v823_v17 }
  0xba   :  { %2702 = vset.pattern.permute.xlu1 %v2769_v1  ;;  %v336_v23 = vpop.permute.xlu1 %335 }
  0xbb   :  { %v472_v24 = vmul.f32 %v3038_v49, %v336_v23  ;;  %180 = vperm.xlu1 %2702, %v2981_v33   ;;  %2322 = vmatmul.mubr.bf16.gmra.mrb[8].mxu0 %v859_v20  ;;  %v3201_v20 = vld [vmem:[%s3945_s0 + $0x120] sm:$0xff] }
  0xbc   :  { %2325 = vmatprep.mubr.msk.bf16.mxu0 %vm2772_vm0, %v2770_v4  ;;  %2396 = vmatpush3.bf16.msra.mxu1 %v2745_v30 }
  0xbd   :  { %v510_v39 = vadd.f32 %v472_v24, %v278_v25  ;;  %2397 = vmatprep.subr.bf16.mxu1 %v2770_v4 }
  0xbe   :  { %v340_v40 = vpop.permute.xlu1 %339 }
  0xbf   :  { %2704 = vset.pattern.permute.xlu1 %v2768_v0  ;;  %v473_v42 = vmul.f32 %v3038_v49, %v340_v40  ;;  %v742_v44 = vadd.f32 %v704_v27, %v510_v39 }
  0xc0   :  { %391 = vperm.xlu1 %2704, %v2981_v33   ;;  %v3160_v33 = vld [vmem:[%s3945_s0 + $0x118] sm:$0xff] }
  0xc1   :  { %v511_v19 = vadd.f32 %v473_v42, %v279_v43  ;;  %v787_v52 = vadd.f32 %v3068_v5, %v742_v44  ;;  %255 = vperm.xlu0 %2728, %v3160_v33   ;;  %v2746_v43 = vld [vmem:[%s3949_s5 + $0x20] sm:$0xff]  }
  0xc2   :  { %2398 = vmatpush3.bf16.msra.mxu1 %v2746_v43 }
  0xc3   :  { %v572_v46 = vpop.permute.xlu1 %571  ;;  %v825_v26 = vmax.f32 %v787_v52, 0.0  ;;  %2399 = vmatprep.subr.bf16.mxu1 %v2770_v4  ;;  %v2747_v52 = vld [vmem:[%s3949_s5 + $0x28] sm:$0xff]  }
  0xc4   :  { %v705_v47 = vmul.f32 %v3049_v54, %v572_v46  ;;  %395 = vperm.xlu1 %2704, %v2948_v28  }
  0xc5   :  { %265 = vperm.xlu0 %2728, %v3183_v12  }
  0xc6   :  { %v743_v48 = vadd.f32 %v705_v47, %v511_v19  ;;  %v708_v19 = vmul.f32 %v3049_v54, %v3100_v29  ;;  %2400 = vmatpush3.bf16.msra.mxu1 %v2747_v52  ;;  %v2748_v29 = vld [vmem:[%s3949_s5 + $0x30] sm:$0xff]  }
  0xc7   :  { %2401 = vmatprep.subr.bf16.mxu1 %v2770_v4 }
  0xc8   :  { %v788_v53 = vadd.f32 %v3068_v5, %v743_v48  ;;  %2705 = vset.pattern.permute.xlu1 %v2771_v7  ;;  %v121_v55 = vpop.permute.xlu1 %120 }
  0xc9   :  { %627 = vperm.xlu1 %2705, %v2948_v28   ;;  %v280_v62 = vmul.f32 %v3040_v50, %v121_v55  ;;  %v136_v28 = vpop.permute.xlu0 %135  ;;  %2732 = vset.pattern.permute.xlu0 %v2771_v7 }
  0xca   :  { %v826_v56 = vmax.f32 %v788_v53, 0.0  ;;  %687 = vperm.xlu0 %2732, %v3201_v20   ;;  %v283_v53 = vmul.f32 %v3040_v50, %v136_v28  ;;  %2402 = vmatpush3.bf16.msra.mxu1 %v2748_v29 }
  0xcb   :  { %2403 = vmatprep.subr.bf16.mxu1 %v2770_v4 }
  0xcc   :  { %v860_v57 = vpack.c.bf16 %v826_v56, %v825_v26 }
  0xcd   :  { %2706 = vset.pattern.permute.xlu1 %v2769_v1  ;;  %v344_v60 = vpop.permute.xlu1 %343  ;;  %v3189_v15 = vpop.permute.xlu0 %145 }
  0xce   :  { %v474_v61 = vmul.f32 %v3038_v49, %v344_v60  ;;  %190 = vperm.xlu1 %2706, %v2987_v34   ;;  %2326 = vmatmul.mubr.bf16.gmra.mrb[12].mxu0 %v860_v57  ;;  %v285_v32 = vmul.f32 %v3040_v50, %v3189_v15 }
  0xcf   :  { %2329 = vmatprep.mubr.msk.bf16.mxu0 %vm2772_vm0, %v2770_v4 }
  0xd0   :  { %v512_v6 = vadd.f32 %v474_v61, %v280_v62  ;;  %v2749_v62 = vld [vmem:[%s3949_s5 + $0x38] sm:$0xff]  }
  0xd1   :  { %v348_v8 = vpop.permute.xlu1 %347  ;;  %v3209_v25 = vpop.permute.xlu0 %155  ;;  %2404 = vmatpush3.bf16.msra.mxu1 %v2749_v62 }
  0xd2   :  { %2707 = vset.pattern.permute.xlu1 %v2768_v0  ;;  %v475_v10 = vmul.f32 %v3038_v49, %v348_v8  ;;  %v744_v13 = vadd.f32 %v706_v3, %v512_v6  ;;  %2573 = vmatprep.subr.bf16.mxu1 %v2770_v4 }
  0xd3   :  { %399 = vperm.xlu1 %2707, %v2987_v34  }
  0xd4   :  { %v513_v16 = vadd.f32 %v475_v10, %v281_v11  ;;  %v789_v18 = vadd.f32 %v3068_v5, %v744_v13 }
  0xd5   :  { %v3222_v46 = vpop.permute.xlu0 %165 }
  0xd6   :  { %v580_v14 = vpop.permute.xlu1 %579  ;;  %v827_v27 = vmax.f32 %v789_v18, 0.0 }
  0xd7   :  { %v707_v34 = vmul.f32 %v3049_v54, %v580_v14  ;;  %403 = vperm.xlu1 %2707, %v3008_v37  }
  0xd9   :  { %v745_v17 = vadd.f32 %v707_v34, %v513_v16  ;;  %v3237_v56 = vpop.permute.xlu0 %175 }
  0xdb   :  { %v790_v23 = vadd.f32 %v3068_v5, %v745_v17  ;;  %2708 = vset.pattern.permute.xlu1 %v2771_v7  ;;  %v131_v24 = vpop.permute.xlu1 %130 }
  0xdc   :  { %635 = vperm.xlu1 %2708, %v3008_v37   ;;  %v282_v44 = vmul.f32 %v3040_v50, %v131_v24 }
  0xdd   :  { %v828_v39 = vmax.f32 %v790_v23, 0.0  ;;  %v3251_v3 = vpop.permute.xlu0 %185 }
  0xdf   :  { %v861_v40 = vpack.c.bf16 %v828_v39, %v827_v27 }
  0xe0   :  { %2709 = vset.pattern.permute.xlu1 %v2769_v1  ;;  %v352_v42 = vpop.permute.xlu1 %351 }
  0xe1   :  { %v476_v37 = vmul.f32 %v3038_v49, %v352_v42  ;;  %200 = vperm.xlu1 %2709, %v2995_v35   ;;  %2330 = vmatmul.mubr.bf16.gmra.mrb[16].mxu0 %v861_v40  ;;  %v592_v13 = vpop.permute.xlu0 %591 }
  0xe2   :  { %2333 = vmatprep.mubr.msk.bf16.mxu0 %vm2772_vm0, %v2770_v4  ;;  %v710_v16 = vmul.f32 %v3049_v54, %v592_v13  ;;  %v289_v13 = vmul.f32 %v3040_v50, %v3222_v46 }
  0xe3   :  { %v514_v47 = vadd.f32 %v476_v37, %v282_v44 }
  0xe4   :  { %v356_v48 = vpop.permute.xlu1 %355 }
  0xe5   :  { %2710 = vset.pattern.permute.xlu1 %v2768_v0  ;;  %v477_v55 = vmul.f32 %v3038_v49, %v356_v48  ;;  %v746_v26 = vadd.f32 %v708_v19, %v514_v47  ;;  %v600_v19 = vpop.permute.xlu0 %599 }
  0xe6   :  { %407 = vperm.xlu1 %2710, %v2995_v35  }
  0xe7   :  { %v515_v58 = vadd.f32 %v477_v55, %v283_v53  ;;  %v791_v61 = vadd.f32 %v3068_v5, %v746_v26  ;;  %v287_v53 = vmul.f32 %v3040_v50, %v3209_v25 }
  0xe9   :  { %v588_v57 = vpop.permute.xlu1 %587  ;;  %v829_v6 = vmax.f32 %v791_v61, 0.0 }
  0xea   :  { %v709_v60 = vmul.f32 %v3049_v54, %v588_v57  ;;  %411 = vperm.xlu1 %2710, %v3016_v38  }
  0xec   :  { %v747_v35 = vadd.f32 %v709_v60, %v515_v58 }
  0xee   :  { %v792_v28 = vadd.f32 %v3068_v5, %v747_v35  ;;  %2711 = vset.pattern.permute.xlu1 %v2771_v7  ;;  %v141_v63 = vpop.permute.xlu1 %140 }
  0xef   :  { %643 = vperm.xlu1 %2711, %v3016_v38   ;;  %v284_v14 = vmul.f32 %v3040_v50, %v141_v63 }
  0xf0   :  { %v830_v8 = vmax.f32 %v792_v28, 0.0 }
  0xf2   :  { %v862_v10 = vpack.c.bf16 %v830_v8, %v829_v6  ;;  %v608_v8 = vpop.permute.xlu0 %607 }
  0xf3   :  { %2712 = vset.pattern.permute.xlu1 %v2769_v1  ;;  %v360_v11 = vpop.permute.xlu1 %359 }
  0xf4   :  { %v478_v22 = vmul.f32 %v3038_v49, %v360_v11  ;;  %210 = vperm.xlu1 %2712, %v3001_v36   ;;  %2334 = vmatmul.mubr.bf16.gmra.mrb[20].mxu0 %v862_v10 }
  0xf5   :  { %2337 = vmatprep.mubr.msk.bf16.mxu0 %vm2772_vm0, %v2770_v4 }
  0xf6   :  { %v516_v38 = vadd.f32 %v478_v22, %v284_v14 }
  0xf7   :  { %v364_v34 = vpop.permute.xlu1 %363 }
  0xf8   :  { %2713 = vset.pattern.permute.xlu1 %v2768_v0  ;;  %v479_v17 = vmul.f32 %v3038_v49, %v364_v34  ;;  %v748_v18 = vadd.f32 %v710_v16, %v516_v38 }
  0xf9   :  { %415 = vperm.xlu1 %2713, %v3001_v36  }
  0xfa   :  { %v517_v24 = vadd.f32 %v479_v17, %v285_v32  ;;  %v793_v27 = vadd.f32 %v3068_v5, %v748_v18 }
  0xfc   :  { %v596_v23 = vpop.permute.xlu1 %595  ;;  %v831_v15 = vmax.f32 %v793_v27, 0.0 }
  0xfd   :  { %v711_v30 = vmul.f32 %v3049_v54, %v596_v23  ;;  %419 = vperm.xlu1 %2713, %v3024_v41  }
  0xff   :  { %v749_v39 = vadd.f32 %v711_v30, %v517_v24 }
 0x101   :  { %v794_v40 = vadd.f32 %v3068_v5, %v749_v39  ;;  %2715 = vset.pattern.permute.xlu1 %v2771_v7  ;;  %v151_v42 = vpop.permute.xlu1 %150 }
 0x102   :  { %651 = vperm.xlu1 %2715, %v3024_v41   ;;  %v286_v47 = vmul.f32 %v3040_v50, %v151_v42  ;;  %v712_v41 = vmul.f32 %v3049_v54, %v600_v19 }
 0x103   :  { %v832_v43 = vmax.f32 %v794_v40, 0.0  ;;  %v616_v40 = vpop.permute.xlu0 %615 }
 0x105   :  { %v863_v36 = vpack.c.bf16 %v832_v43, %v831_v15 }
 0x106   :  { %2716 = vset.pattern.permute.xlu1 %v2769_v1  ;;  %v368_v37 = vpop.permute.xlu1 %367 }
 0x107   :  { %v480_v44 = vmul.f32 %v3038_v49, %v368_v37  ;;  %220 = vperm.xlu1 %2716, %v3073_v9   ;;  %2338 = vmatmul.mubr.bf16.gmra.mrb[24].mxu0 %v863_v36  ;;  %v291_v36 = vmul.f32 %v3040_v50, %v3237_v56 }
 0x108   :  { %2341 = vmatprep.mubr.msk.bf16.mxu0 %vm2772_vm0, %v2770_v4 }
 0x109   :  { %v518_v48 = vadd.f32 %v480_v44, %v286_v47 }
 0x10a   :  { %v372_v52 = vpop.permute.xlu1 %371 }
 0x10b   :  { %2717 = vset.pattern.permute.xlu1 %v2768_v0  ;;  %v481_v55 = vmul.f32 %v3038_v49, %v372_v52  ;;  %v750_v26 = vadd.f32 %v712_v41, %v518_v48 }
 0x10c   :  { %423 = vperm.xlu1 %2717, %v3073_v9  }
 0x10d   :  { %v519_v57 = vadd.f32 %v481_v55, %v287_v53  ;;  %v795_v60 = vadd.f32 %v3068_v5, %v750_v26 }
 0x10f   :  { %v604_v29 = vpop.permute.xlu1 %603  ;;  %v833_v25 = vmax.f32 %v795_v60, 0.0 }
 0x110   :  { %v713_v58 = vmul.f32 %v3049_v54, %v604_v29  ;;  %427 = vperm.xlu1 %2717, %v3033_v45  }
 0x112   :  { %v751_v35 = vadd.f32 %v713_v58, %v519_v57  ;;  %v624_v57 = vpop.permute.xlu0 %623 }
 0x114   :  { %v796_v61 = vadd.f32 %v3068_v5, %v751_v35  ;;  %2718 = vset.pattern.permute.xlu1 %v2771_v7  ;;  %v161_v62 = vpop.permute.xlu1 %160 }
 0x115   :  { %659 = vperm.xlu1 %2718, %v3033_v45   ;;  %v288_v10 = vmul.f32 %v3040_v50, %v161_v62  ;;  %v714_v45 = vmul.f32 %v3049_v54, %v608_v8 }
 0x116   :  { %v834_v28 = vmax.f32 %v796_v61, 0.0  ;;  %v632_v62 = vpop.permute.xlu0 %631 }
 0x118   :  { %v864_v9 = vpack.c.bf16 %v834_v28, %v833_v25  ;;  %v293_v25 = vmul.f32 %v3040_v50, %v3251_v3 }
 0x119   :  { %2719 = vset.pattern.permute.xlu1 %v2769_v1  ;;  %v376_v63 = vpop.permute.xlu1 %375 }
 0x11a   :  { %v482_v6 = vmul.f32 %v3038_v49, %v376_v63  ;;  %230 = vperm.xlu1 %2719, %v3091_v21   ;;  %2342 = vmatmul.mubr.bf16.gmra.mrb[28].mxu0 %v864_v9 }
 0x11b   :  { %2345 = vmatprep.mubr.msk.bf16.mxu0 %vm2772_vm0, %v2770_v4 }
 0x11c   :  { %v520_v11 = vadd.f32 %v482_v6, %v288_v10  ;;  %v640_v10 = vpop.permute.xlu0 %639 }
 0x11d   :  { %v380_v22 = vpop.permute.xlu1 %379 }
 0x11e   :  { %2720 = vset.pattern.permute.xlu1 %v2768_v0  ;;  %v483_v14 = vmul.f32 %v3038_v49, %v380_v22  ;;  %v752_v38 = vadd.f32 %v714_v45, %v520_v11 }
 0x11f   :  { %431 = vperm.xlu1 %2720, %v3091_v21  }
 0x120   :  { %v521_v34 = vadd.f32 %v483_v14, %v289_v13  ;;  %v797_v17 = vadd.f32 %v3068_v5, %v752_v38  ;;  %v3345_v14 = vpop.permute.xlu0 %647 }
 0x122   :  { %v612_v16 = vpop.permute.xlu1 %611  ;;  %v835_v46 = vmax.f32 %v797_v17, 0.0 }
 0x123   :  { %v715_v32 = vmul.f32 %v3049_v54, %v612_v16  ;;  %435 = vperm.xlu1 %2720, %v3045_v51  }
 0x124   :  { %v196_v17 = vpop.permute.xlu0 %195 }
 0x125   :  { %v753_v18 = vadd.f32 %v715_v32, %v521_v34 }
 0x127   :  { %v798_v23 = vadd.f32 %v3068_v5, %v753_v18  ;;  %2721 = vset.pattern.permute.xlu1 %v2771_v7  ;;  %v171_v24 = vpop.permute.xlu1 %170 }
 0x128   :  { %667 = vperm.xlu1 %2721, %v3045_v51   ;;  %v290_v42 = vmul.f32 %v3040_v50, %v171_v24  ;;  %v716_v51 = vmul.f32 %v3049_v54, %v616_v40  ;;  %v295_v24 = vmul.f32 %v3040_v50, %v196_v17 }
 0x129   :  { %v836_v30 = vmax.f32 %v798_v23, 0.0 }
 0x12b   :  { %v865_v21 = vpack.c.bf16 %v836_v30, %v835_v46 }
 0x12c   :  { %2722 = vset.pattern.permute.xlu1 %v2769_v1  ;;  %v384_v27 = vpop.permute.xlu1 %383 }
 0x12d   :  { %v484_v39 = vmul.f32 %v3038_v49, %v384_v27  ;;  %240 = vperm.xlu1 %2722, %v3119_v2   ;;  %2346 = vmatmul.mubr.bf16.gmra.mrb[32].mxu0 %v865_v21 }
 0x12e   :  { %2349 = vmatprep.mubr.msk.bf16.mxu0 %vm2772_vm0, %v2770_v4 }
 0x12f   :  { %v522_v15 = vadd.f32 %v484_v39, %v290_v42 }
 0x130   :  { %v388_v43 = vpop.permute.xlu1 %387 }
 0x131   :  { %2724 = vset.pattern.permute.xlu1 %v2768_v0  ;;  %v485_v37 = vmul.f32 %v3038_v49, %v388_v43  ;;  %v754_v44 = vadd.f32 %v716_v51, %v522_v15 }
 0x132   :  { %439 = vperm.xlu1 %2724, %v3119_v2  }
 0x133   :  { %v523_v47 = vadd.f32 %v485_v37, %v291_v36  ;;  %v799_v41 = vadd.f32 %v3068_v5, %v754_v44  ;;  %v3368_v37 = vld [vmem:[%s3950_s4] ss:$0 sm:$0xff] }
 0x135   :  { %v620_v19 = vpop.permute.xlu1 %619  ;;  %v837_v56 = vmax.f32 %v799_v41, 0.0 }
 0x136   :  { %v717_v48 = vmul.f32 %v3049_v54, %v620_v19  ;;  %443 = vperm.xlu1 %2724, %v3059_v59   ;;  %v206_v19 = vpop.permute.xlu0 %205 }
 0x138   :  { %v755_v52 = vadd.f32 %v717_v48, %v523_v47 }
 0x13a   :  { %v800_v53 = vadd.f32 %v3068_v5, %v755_v52  ;;  %2725 = vset.pattern.permute.xlu1 %v2771_v7  ;;  %v181_v55 = vpop.permute.xlu1 %180 }
 0x13b   :  { %675 = vperm.xlu1 %2725, %v3059_v59   ;;  %v292_v60 = vmul.f32 %v3040_v50, %v181_v55  ;;  %v718_v59 = vmul.f32 %v3049_v54, %v624_v57 }
 0x13c   :  { %v838_v26 = vmax.f32 %v800_v53, 0.0 }
 0x13e   :  { %v866_v2 = vpack.c.bf16 %v838_v26, %v837_v56  ;;  %v297_v56 = vmul.f32 %v3040_v50, %v206_v19 }
 0x13f   :  { %2726 = vset.pattern.permute.xlu1 %v2769_v1  ;;  %v392_v29 = vpop.permute.xlu1 %391 }
 0x140   :  { %v486_v58 = vmul.f32 %v3038_v49, %v392_v29  ;;  %250 = vperm.xlu1 %2726, %v3145_v31   ;;  %2350 = vmatmul.mubr.bf16.gmra.mrb[36].mxu0 %v866_v2 }
 0x141   :  { %2353 = vmatprep.mubr.msk.bf16.mxu0 %vm2772_vm0, %v2770_v4 }
 0x142   :  { %v524_v35 = vadd.f32 %v486_v58, %v292_v60 }
 0x143   :  { %v396_v61 = vpop.permute.xlu1 %395 }
 0x144   :  { %2727 = vset.pattern.permute.xlu1 %v2768_v0  ;;  %v487_v28 = vmul.f32 %v3038_v49, %v396_v61  ;;  %v756_v9 = vadd.f32 %v718_v59, %v524_v35 }
 0x145   :  { %447 = vperm.xlu1 %2727, %v3145_v31  }
 0x146   :  { %v525_v6 = vadd.f32 %v487_v28, %v293_v25  ;;  %v801_v11 = vadd.f32 %v3068_v5, %v756_v9 }
 0x148   :  { %v628_v63 = vpop.permute.xlu1 %627  ;;  %v839_v13 = vmax.f32 %v801_v11, 0.0 }
 0x149   :  { %v719_v8 = vmul.f32 %v3049_v54, %v628_v63  ;;  %451 = vperm.xlu1 %2727, %v3160_v33   ;;  %v216_v63 = vpop.permute.xlu0 %215 }
 0x14b   :  { %v757_v45 = vadd.f32 %v719_v8, %v525_v6 }
 0x14d   :  { %v802_v22 = vadd.f32 %v3068_v5, %v757_v45  ;;  %2729 = vset.pattern.permute.xlu1 %v2771_v7  ;;  %v191_v3 = vpop.permute.xlu1 %190 }
 0x14e   :  { %683 = vperm.xlu1 %2729, %v3160_v33   ;;  %v294_v32 = vmul.f32 %v3040_v50, %v191_v3  ;;  %v720_v33 = vmul.f32 %v3049_v54, %v632_v62 }
 0x14f   :  { %v840_v31 = vmax.f32 %v802_v22, 0.0  ;;  %v226_v22 = vpop.permute.xlu0 %225 }
 0x151   :  { %v867_v38 = vpack.c.bf16 %v840_v31, %v839_v13  ;;  %v724_v13 = vmul.f32 %v3049_v54, %v3345_v14 }
 0x152   :  { %2730 = vset.pattern.permute.xlu1 %v2769_v1  ;;  %v400_v16 = vpop.permute.xlu1 %399 }
 0x153   :  { %v488_v34 = vmul.f32 %v3038_v49, %v400_v16  ;;  %260 = vperm.xlu1 %2730, %v3201_v20   ;;  %2354 = vmatmul.mubr.bf16.gmra.mrb[40].mxu0 %v867_v38 }
 0x154   :  { %2357 = vmatprep.mubr.msk.bf16.mxu0 %vm2772_vm0, %v2770_v4 }
 0x155   :  { %v526_v18 = vadd.f32 %v488_v34, %v294_v32  ;;  %v299_v34 = vmul.f32 %v3040_v50, %v216_v63  ;;  %v3391_v32 = vpop.permute.xlu0 %235 }
 0x156   :  { %v404_v23 = vpop.permute.xlu1 %403 }
 0x157   :  { %2731 = vset.pattern.permute.xlu1 %v2768_v0  ;;  %v489_v1 = vmul.f32 %v3038_v49, %v404_v23  ;;  %v758_v46 = vadd.f32 %v720_v33, %v526_v18 }
 0x158   :  { %455 = vperm.xlu1 %2731, %v3201_v20  }
 0x159   :  { %v527_v21 = vadd.f32 %v489_v1, %v295_v24  ;;  %v803_v40 = vadd.f32 %v3068_v5, %v758_v46 }
 0x15b   :  { %v636_v30 = vpop.permute.xlu1 %635  ;;  %v841_v51 = vmax.f32 %v803_v40, 0.0 }
 0x15c   :  { %v721_v27 = vmul.f32 %v3049_v54, %v636_v30  ;;  %459 = vperm.xlu1 %2731, %v3183_v12  }
 0x15e   :  { %v759_v39 = vadd.f32 %v721_v27, %v527_v21  ;;  %v3396_v27 = vpop.permute.xlu0 %245 }
 0x160   :  { %v804_v42 = vadd.f32 %v3068_v5, %v759_v39  ;;  %2733 = vset.pattern.permute.xlu1 %v2771_v7  ;;  %v201_v0 = vpop.permute.xlu1 %200 }
 0x161   :  { %691 = vperm.xlu1 %2733, %v3183_v12   ;;  %v296_v44 = vmul.f32 %v3040_v50, %v201_v0  ;;  %v722_v12 = vmul.f32 %v3049_v54, %v640_v10 }
 0x162   :  { %v842_v15 = vmax.f32 %v804_v42, 0.0 }
 0x164   :  { %v868_v20 = vpack.c.bf16 %v842_v15, %v841_v51 }
 0x165   :  { %v408_v43 = vpop.permute.xlu1 %407 }
 0x166   :  { %v490_v36 = vmul.f32 %v3038_v49, %v408_v43  ;;  %2358 = vmatmul.mubr.bf16.gmra.mrb[44].mxu0 %v868_v20 }
 0x167   :  { %2361 = vmatprep.mubr.msk.bf16.mxu0 %vm2772_vm0, %v2770_v4 }
 0x168   :  { %v981_v7 = vpop.f32.mrb[0].mxu0  ;;  %v528_v47 = vadd.f32 %v490_v36, %v296_v44 }
 0x169   :  { %v982_v48 = vadd.f32 %v3368_v37, %v981_v7  ;;  %v412_v41 = vpop.permute.xlu1 %411  ;;  %v2315_v52 = vpop.f32.mrb[1].mxu0 }
 0x16a   :  { %v984_v53 = vpop.f32.mrb[2].mxu0  ;;  %v491_v55 = vmul.f32 %v3038_v49, %v412_v41  ;;  %v760_v29 = vadd.f32 %v722_v12, %v528_v47  ;;  %v656_v12 = vpop.permute.xlu0 %655 }
 0x16b   :  { %v985_v26 = vadd.f32 %v3368_v37, %v984_v53  ;;  %v2316_v2 = vpop.f32.mrb[3].mxu0  ;;  %v1132_v57 = vmax.f32 %v982_v48, 0.0  ;;  %v726_v52 = vmul.f32 %v3049_v54, %v656_v12 }
 0x16c   :  { %v529_v35 = vadd.f32 %v491_v55, %v297_v56  ;;  %v805_v25 = vadd.f32 %v3068_v5, %v760_v29  ;;  %v301_v2 = vmul.f32 %v3040_v50, %v226_v22 }
 0x16d   :  { %v1133_v58 = vmax.f32 %v985_v26, 0.0 }
 0x16e   :  { %v644_v60 = vpop.permute.xlu1 %643  ;;  %v843_v8 = vmax.f32 %v805_v25, 0.0 }
 0x16f   :  { %v1170_v59 = vpack.c.bf16 %v1133_v58, %v1132_v57  ;;  %v723_v61 = vmul.f32 %v3049_v54, %v644_v60 }
 0x171   :  { %v761_v62 = vadd.f32 %v723_v61, %v529_v35  ;;  %2406 = vmatmul.mubr.bf16.vlgmr.msra.gmra.mrb[0].mxu1 %v1170_v59 }
 0x172   :  { %2409 = vmatprep.mubr.msk.bf16.mxu1 %vm2772_vm0, %v2770_v4 }
 0x173   :  { %v806_v28 = vadd.f32 %v3068_v5, %v761_v62  ;;  %v211_v9 = vpop.permute.xlu1 %210 }
 0x174   :  { %v298_v3 = vmul.f32 %v3040_v50, %v211_v9 }
 0x175   :  { %v844_v6 = vmax.f32 %v806_v28, 0.0 }
 0x177   :  { %v869_v10 = vpack.c.bf16 %v844_v6, %v843_v8 }
 0x178   :  { %v416_v11 = vpop.permute.xlu1 %415 }
 0x179   :  { %v492_v45 = vmul.f32 %v3038_v49, %v416_v11  ;;  %2362 = vmatmul.mubr.bf16.gmra.mrb[48].mxu0 %v869_v10 }
 0x17a   :  { %2365 = vmatprep.mubr.msk.bf16.mxu0 %vm2772_vm0, %v2770_v4 }
 0x17b   :  { %v530_v31 = vadd.f32 %v492_v45, %v298_v3 }
 0x17c   :  { %v420_v38 = vpop.permute.xlu1 %419 }
 0x17d   :  { %v493_v16 = vmul.f32 %v3038_v49, %v420_v38  ;;  %v762_v17 = vadd.f32 %v724_v13, %v530_v31  ;;  %v664_v13 = vpop.permute.xlu0 %663 }
 0x17f   :  { %v531_v18 = vadd.f32 %v493_v16, %v299_v34  ;;  %v807_v14 = vadd.f32 %v3068_v5, %v762_v17  ;;  %v728_v34 = vmul.f32 %v3049_v54, %v664_v13  ;;  %v2755_v13 = vld [vmem:[%s3951_s7 + $0x28] sm:$0xff]  }
 0x181   :  { %v652_v33 = vpop.permute.xlu1 %651  ;;  %v845_v43 = vmax.f32 %v807_v14, 0.0 }
 0x182   :  { %v725_v23 = vmul.f32 %v3049_v54, %v652_v33 }
 0x183   :  { %v989_v1 = vpop.f32.mrb[4].mxu0 }
 0x184   :  { %v763_v24 = vadd.f32 %v725_v23, %v531_v18  ;;  %v990_v46 = vadd.f32 %v3368_v37, %v989_v1  ;;  %v2319_v30 = vpop.f32.mrb[5].mxu0  ;;  %v303_v23 = vmul.f32 %v3040_v50, %v3391_v32 }
 0x185   :  { %v992_v21 = vpop.f32.mrb[6].mxu0 }
 0x186   :  { %v808_v39 = vadd.f32 %v3068_v5, %v763_v24  ;;  %v993_v40 = vadd.f32 %v3368_v37, %v992_v21  ;;  %v221_v42 = vpop.permute.xlu1 %220  ;;  %v2320_v0 = vpop.f32.mrb[7].mxu0  ;;  %v1134_v51 = vmax.f32 %v990_v46, 0.0 }
 0x187   :  { %v300_v47 = vmul.f32 %v3040_v50, %v221_v42 }
 0x188   :  { %v846_v15 = vmax.f32 %v808_v39, 0.0  ;;  %v1135_v20 = vmax.f32 %v993_v40, 0.0 }
 0x18a   :  { %v1171_v36 = vpack.c.bf16 %v1135_v20, %v1134_v51  ;;  %v870_v44 = vpack.c.bf16 %v846_v15, %v845_v43  ;;  %v3430_v15 = vld [vmem:[%s3948_s2] ss:$0 sm:$0xff] }
 0x18b   :  { %v424_v7 = vpop.permute.xlu1 %423 }
 0x18c   :  { %v494_v19 = vmul.f32 %v3038_v49, %v424_v7  ;;  %2366 = vmatmul.mubr.bf16.gmra.mrb[52].mxu0 %v870_v44  ;;  %2410 = vmatmul.mubr.bf16.gmra.mrb[4].mxu1 %v1171_v36  ;;  %v2750_v36 = vld [vmem:[%s3951_s7] sm:$0xff]  }
 0x18d   :  { %2413 = vmatprep.mubr.msk.bf16.mxu1 %vm2772_vm0, %v2770_v4  ;;  %2369 = vmatprep.mubr.msk.bf16.mxu0 %vm2772_vm0, %v2770_v4 }
 0x18e   :  { %v997_v48 = vpop.f32.mrb[8].mxu0  ;;  %v532_v41 = vadd.f32 %v494_v19, %v300_v47  ;;  %2482 = vmatpush3.bf16.msra.mxu0 %v2750_v36  ;;  %v2751_v19 = vld [vmem:[%s3951_s7 + $0x8] sm:$0xff]  }
 0x18f   :  { %v998_v53 = vadd.f32 %v3368_v37, %v997_v48  ;;  %v428_v55 = vpop.permute.xlu1 %427  ;;  %v2323_v56 = vpop.f32.mrb[9].mxu0  ;;  %2483 = vmatprep.subr.bf16.mxu0 %v2770_v4 }
 0x190   :  { %v1000_v26 = vpop.f32.mrb[10].mxu0  ;;  %v495_v29 = vmul.f32 %v3038_v49, %v428_v55  ;;  %v764_v60 = vadd.f32 %v726_v52, %v532_v41  ;;  %v672_v41 = vpop.permute.xlu0 %671 }
 0x191   :  { %v1001_v57 = vadd.f32 %v3368_v37, %v1000_v26  ;;  %v2324_v58 = vpop.f32.mrb[11].mxu0  ;;  %v1136_v35 = vmax.f32 %v998_v53, 0.0  ;;  %v2752_v53 = vld [vmem:[%s3951_s7 + $0x10] sm:$0xff]   ;;  %v730_v26 = vmul.f32 %v3049_v54, %v672_v41 }
 0x192   :  { %v533_v62 = vadd.f32 %v495_v29, %v301_v2  ;;  %v809_v9 = vadd.f32 %v3068_v5, %v764_v60  ;;  %2484 = vmatpush3.bf16.msra.mxu0 %v2751_v19 }
 0x193   :  { %v1137_v59 = vmax.f32 %v1001_v57, 0.0  ;;  %2485 = vmatprep.subr.bf16.mxu0 %v2770_v4 }
 0x194   :  { %v660_v61 = vpop.permute.xlu1 %659  ;;  %v847_v10 = vmax.f32 %v809_v9, 0.0 }
 0x195   :  { %v1172_v25 = vpack.c.bf16 %v1137_v59, %v1136_v35  ;;  %v727_v28 = vmul.f32 %v3049_v54, %v660_v61  ;;  %v2753_v61 = vld [vmem:[%s3951_s7 + $0x18] sm:$0xff]  }
 0x196   :  { %2486 = vmatpush3.bf16.msra.mxu0 %v2752_v53 }
 0x197   :  { %v765_v63 = vadd.f32 %v727_v28, %v533_v62  ;;  %2414 = vmatmul.mubr.bf16.gmra.mrb[8].mxu1 %v1172_v25  ;;  %2487 = vmatprep.subr.bf16.mxu0 %v2770_v4  ;;  %v305_v62 = vmul.f32 %v3040_v50, %v3396_v27 }
 0x198   :  { %2417 = vmatprep.mubr.msk.bf16.mxu1 %vm2772_vm0, %v2770_v4 }
 0x199   :  { %v810_v6 = vadd.f32 %v3068_v5, %v765_v63  ;;  %v231_v8 = vpop.permute.xlu1 %230 }
 0x19a   :  { %v302_v31 = vmul.f32 %v3040_v50, %v231_v8  ;;  %2488 = vmatpush3.bf16.msra.mxu0 %v2753_v61 }
 0x19b   :  { %v848_v11 = vmax.f32 %v810_v6, 0.0  ;;  %2489 = vmatprep.subr.bf16.mxu0 %v2770_v4 }
 0x19d   :  { %v871_v45 = vpack.c.bf16 %v848_v11, %v847_v10  ;;  %v2754_v11 = vld [vmem:[%s3951_s7 + $0x20] sm:$0xff]  }
 0x19e   :  { %v432_v22 = vpop.permute.xlu1 %431  ;;  %2490 = vmatpush3.bf16.msra.mxu0 %v2754_v11 }
 0x19f   :  { %v496_v3 = vmul.f32 %v3038_v49, %v432_v22  ;;  %2370 = vmatmul.mubr.bf16.gmra.mrb[56].mxu0 %v871_v45  ;;  %2491 = vmatprep.subr.bf16.mxu0 %v2770_v4 }
 0x1a0   :  { %2373 = vmatprep.mubr.msk.bf16.mxu0 %vm2772_vm0, %v2770_v4 }
 0x1a1   :  { %v1005_v38 = vpop.f32.mrb[12].mxu0  ;;  %v534_v16 = vadd.f32 %v496_v3, %v302_v31 }
 0x1a2   :  { %v1006_v5 = vadd.f32 %v3368_v37, %v1005_v38  ;;  %v436_v17 = vpop.permute.xlu1 %435  ;;  %v2327_v33 = vpop.f32.mrb[13].mxu0  ;;  %2492 = vmatpush3.bf16.msra.mxu0 %v2755_v13 }
 0x1a3   :  { %v1008_v18 = vpop.f32.mrb[14].mxu0  ;;  %v497_v1 = vmul.f32 %v3038_v49, %v436_v17  ;;  %v766_v30 = vadd.f32 %v728_v34, %v534_v16  ;;  %v680_v16 = vpop.permute.xlu0 %679  ;;  %2493 = vmatprep.subr.bf16.mxu0 %v2770_v4  ;;  %v2756_v17 = vld [vmem:[%s3951_s7 + $0x30] sm:$0xff]  }
 0x1a4   :  { %v1009_v24 = vadd.f32 %v3368_v37, %v1008_v18  ;;  %v2328_v46 = vpop.f32.mrb[15].mxu0  ;;  %v1138_v14 = vmax.f32 %v1006_v5, 0.0 }
 0x1a5   :  { %v535_v40 = vadd.f32 %v497_v1, %v303_v23  ;;  %v811_v32 = vadd.f32 %v3430_v15, %v766_v30 }
 0x1a6   :  { %v1139_v21 = vmax.f32 %v1009_v24, 0.0  ;;  %2494 = vmatpush3.bf16.msra.mxu0 %v2756_v17 }
 0x1a7   :  { %v668_v39 = vpop.permute.xlu1 %667  ;;  %v849_v44 = vmax.f32 %v811_v32, 0.0  ;;  %v256_v1 = vpop.permute.xlu0 %255  ;;  %2495 = vmatprep.subr.bf16.mxu0 %v2770_v4 }
 0x1a8   :  { %v1173_v42 = vpack.c.bf16 %v1139_v21, %v1138_v14  ;;  %v729_v0 = vmul.f32 %v3049_v54, %v668_v39  ;;  %v2757_v21 = vld [vmem:[%s3951_s7 + $0x38] sm:$0xff]  }
 0x1aa   :  { %v767_v51 = vadd.f32 %v729_v0, %v535_v40  ;;  %2418 = vmatmul.mubr.bf16.gmra.mrb[12].mxu1 %v1173_v42  ;;  %v732_v40 = vmul.f32 %v3049_v54, %v680_v16  ;;  %v307_v0 = vmul.f32 %v3040_v50, %v256_v1  ;;  %2496 = vmatpush3.bf16.msra.mxu0 %v2757_v21 }
 0x1ab   :  { %2421 = vmatprep.mubr.msk.bf16.mxu1 %vm2772_vm0, %v2770_v4  ;;  %v266_v53 = vpop.permute.xlu0 %265 }
 0x1ac   :  { %v812_v20 = vadd.f32 %v3430_v15, %v767_v51  ;;  %v241_v43 = vpop.permute.xlu1 %240 }
 0x1ad   :  { %v304_v52 = vmul.f32 %v3040_v50, %v241_v43 }
 0x1ae   :  { %v850_v7 = vmax.f32 %v812_v20, 0.0 }
 0x1b0   :  { %v872_v12 = vpack.c.bf16 %v850_v7, %v849_v44 }
 0x1b1   :  { %v440_v47 = vpop.permute.xlu1 %439 }
 0x1b2   :  { %v498_v48 = vmul.f32 %v3038_v49, %v440_v47  ;;  %2374 = vmatmul.mubr.bf16.gmra.mrb[60].mxu0 %v872_v12 }
 0x1b3   :  { %2377 = vmatprep.mubr.msk.bf16.mxu0 %vm2772_vm0, %v2770_v4 }
 0x1b4   :  { %v1013_v55 = vpop.f32.mrb[16].mxu0  ;;  %v536_v56 = vadd.f32 %v498_v48, %v304_v52 }
 0x1b5   :  { %v1014_v2 = vadd.f32 %v3368_v37, %v1013_v55  ;;  %v444_v29 = vpop.permute.xlu1 %443  ;;  %v2331_v57 = vpop.f32.mrb[17].mxu0 }
 0x1b6   :  { %v1016_v58 = vpop.f32.mrb[18].mxu0  ;;  %v499_v60 = vmul.f32 %v3038_v49, %v444_v29  ;;  %v768_v25 = vadd.f32 %v730_v26, %v536_v56  ;;  %v688_v57 = vpop.permute.xlu0 %687 }
 0x1b7   :  { %v1017_v35 = vadd.f32 %v3368_v37, %v1016_v58  ;;  %v2332_v59 = vpop.f32.mrb[19].mxu0  ;;  %v1140_v28 = vmax.f32 %v1014_v2, 0.0 }
 0x1b8   :  { %v537_v6 = vadd.f32 %v499_v60, %v305_v62  ;;  %v813_v45 = vadd.f32 %v3430_v15, %v768_v25  ;;  %v734_v59 = vmul.f32 %v3049_v54, %v688_v57 }
 0x1b9   :  { %v1141_v9 = vmax.f32 %v1017_v35, 0.0 }
 0x1ba   :  { %v676_v63 = vpop.permute.xlu1 %675  ;;  %v851_v31 = vmax.f32 %v813_v45, 0.0 }
 0x1bb   :  { %v1174_v8 = vpack.c.bf16 %v1141_v9, %v1140_v28  ;;  %v731_v10 = vmul.f32 %v3049_v54, %v676_v63 }
 0x1bd   :  { %v769_v22 = vadd.f32 %v731_v10, %v537_v6  ;;  %2422 = vmatmul.mubr.bf16.gmra.mrb[16].mxu1 %v1174_v8  ;;  %v309_v8 = vmul.f32 %v3040_v50, %v266_v53 }
 0x1be   :  { %2425 = vmatprep.mubr.msk.bf16.mxu1 %vm2772_vm0, %v2770_v4 }
 0x1bf   :  { %v814_v27 = vadd.f32 %v3430_v15, %v769_v22  ;;  %v251_v3 = vpop.permute.xlu1 %250 }
 0x1c0   :  { %v306_v18 = vmul.f32 %v3040_v50, %v251_v3 }
 0x1c1   :  { %v852_v38 = vmax.f32 %v814_v27, 0.0 }
 0x1c3   :  { %v873_v34 = vpack.c.bf16 %v852_v38, %v851_v31 }
 0x1c4   :  { %v448_v5 = vpop.permute.xlu1 %447 }
 0x1c5   :  { %v500_v33 = vmul.f32 %v3038_v49, %v448_v5  ;;  %2378 = vmatmul.mubr.bf16.gmra.mrb[64].mxu0 %v873_v34 }
 0x1c6   :  { %2381 = vmatprep.mubr.msk.bf16.mxu0 %vm2772_vm0, %v2770_v4 }
 0x1c7   :  { %v1021_v23 = vpop.f32.mrb[20].mxu0  ;;  %v538_v24 = vadd.f32 %v500_v33, %v306_v18 }
 0x1c8   :  { %v1022_v46 = vadd.f32 %v3368_v37, %v1021_v23  ;;  %v452_v30 = vpop.permute.xlu1 %451  ;;  %v2335_v14 = vpop.f32.mrb[21].mxu0 }
 0x1c9   :  { %v1024_v39 = vpop.f32.mrb[22].mxu0  ;;  %v501_v42 = vmul.f32 %v3038_v49, %v452_v30  ;;  %v770_v20 = vadd.f32 %v732_v40, %v538_v24 }
 0x1ca   :  { %v1025_v32 = vadd.f32 %v3368_v37, %v1024_v39  ;;  %v2336_v51 = vpop.f32.mrb[23].mxu0  ;;  %v1142_v43 = vmax.f32 %v1022_v46, 0.0 }
 0x1cb   :  { %v539_v7 = vadd.f32 %v501_v42, %v307_v0  ;;  %v815_v48 = vadd.f32 %v3430_v15, %v770_v20 }
 0x1cc   :  { %v1143_v36 = vmax.f32 %v1025_v32, 0.0 }
 0x1cd   :  { %v684_v44 = vpop.permute.xlu1 %683  ;;  %v853_v56 = vmax.f32 %v815_v48, 0.0 }
 0x1ce   :  { %v1175_v19 = vpack.c.bf16 %v1143_v36, %v1142_v43  ;;  %v733_v12 = vmul.f32 %v3049_v54, %v684_v44 }
 0x1d0   :  { %v771_v47 = vadd.f32 %v733_v12, %v539_v7  ;;  %2426 = vmatmul.mubr.bf16.gmra.mrb[20].mxu1 %v1175_v19 }
 0x1d1   :  { %2429 = vmatprep.mubr.msk.bf16.mxu1 %vm2772_vm0, %v2770_v4 }
 0x1d2   :  { %v816_v41 = vadd.f32 %v3430_v15, %v771_v47  ;;  %v261_v52 = vpop.permute.xlu1 %260 }
 0x1d3   :  { %v308_v58 = vmul.f32 %v3040_v50, %v261_v52 }
 0x1d4   :  { %v854_v55 = vmax.f32 %v816_v41, 0.0 }
 0x1d6   :  { %v874_v26 = vpack.c.bf16 %v854_v55, %v853_v56 }
 0x1d7   :  { %v456_v2 = vpop.permute.xlu1 %455 }
 0x1d8   :  { %v502_v29 = vmul.f32 %v3038_v49, %v456_v2  ;;  %2382 = vmatmul.mubr.bf16.gmra.mrb[68].mxu0 %v874_v26 }
 0x1d9   :  { %2385 = vmatprep.mubr.msk.bf16.mxu0 %vm2772_vm0, %v2770_v4 }
 0x1da   :  { %v1029_v60 = vpop.f32.mrb[24].mxu0  ;;  %v540_v35 = vadd.f32 %v502_v29, %v308_v58 }
 0x1db   :  { %v1030_v61 = vadd.f32 %v3368_v37, %v1029_v60  ;;  %v460_v62 = vpop.permute.xlu1 %459  ;;  %v2339_v25 = vpop.f32.mrb[25].mxu0 }
 0x1dc   :  { %v1032_v28 = vpop.f32.mrb[26].mxu0  ;;  %v503_v9 = vmul.f32 %v3038_v49, %v460_v62  ;;  %v772_v10 = vadd.f32 %v734_v59, %v540_v35 }
 0x1dd   :  { %v1033_v63 = vadd.f32 %v3368_v37, %v1032_v28  ;;  %v2340_v6 = vpop.f32.mrb[27].mxu0  ;;  %v1144_v11 = vmax.f32 %v1030_v61, 0.0 }
 0x1de   :  { %v541_v27 = vadd.f32 %v503_v9, %v309_v8  ;;  %v817_v31 = vadd.f32 %v3430_v15, %v772_v10  ;;  %v3533_v9 = vld [vmem:[%s3952_s6] ss:$0 sm:$0xff] }
 0x1df   :  { %v1145_v45 = vmax.f32 %v1033_v63, 0.0 }
 0x1e0   :  { %v692_v22 = vpop.permute.xlu1 %691  ;;  %v855_v16 = vmax.f32 %v817_v31, 0.0 }
 0x1e1   :  { %v1176_v3 = vpack.c.bf16 %v1145_v45, %v1144_v11  ;;  %v735_v13 = vmul.f32 %v3049_v54, %v692_v22 }
 0x1e3   :  { %v773_v38 = vadd.f32 %v735_v13, %v541_v27  ;;  %2430 = vmatmul.mubr.bf16.gmra.mrb[24].mxu1 %v1176_v3 }
 0x1e4   :  { %2433 = vmatprep.mubr.msk.bf16.mxu1 %vm2772_vm0, %v2770_v4 }
 0x1e5   :  { %v818_v49 = vadd.f32 %v3430_v15, %v773_v38 }
 0x1e7   :  { %v856_v34 = vmax.f32 %v818_v49, 0.0 }
 0x1e9   :  { %v875_v50 = vpack.c.bf16 %v856_v34, %v855_v16 }
 0x1eb   :  { %2386 = vmatmul.mubr.bf16.gmra.mrb[72].mxu0 %v875_v50 }
 0x1ec   :  { %2497 = vmatprep.mubr.msk.bf16.mxu0 %vm2772_vm0, %v2770_v4 }
 0x1ed   :  { %v1037_v5 = vpop.f32.mrb[28].mxu0 }
 0x1ee   :  { %v1038_v17 = vadd.f32 %v3368_v37, %v1037_v5  ;;  %v2343_v54 = vpop.f32.mrb[29].mxu0 }
 0x1ef   :  { %v1040_v33 = vpop.f32.mrb[30].mxu0 }
 0x1f0   :  { %v1041_v18 = vadd.f32 %v3368_v37, %v1040_v33  ;;  %v2344_v23 = vpop.f32.mrb[31].mxu0  ;;  %v1146_v1 = vmax.f32 %v1038_v17, 0.0 }
 0x1f2   :  { %v1147_v24 = vmax.f32 %v1041_v18, 0.0 }
 0x1f4   :  { %v1177_v46 = vpack.c.bf16 %v1147_v24, %v1146_v1 }
 0x1f6   :  { %2434 = vmatmul.mubr.bf16.gmra.mrb[28].mxu1 %v1177_v46 }
 0x1f7   :  { %2437 = vmatprep.mubr.msk.bf16.mxu1 %vm2772_vm0, %v2770_v4 }
 0x200   :  { %v1045_v15 = vpop.f32.mrb[32].mxu0 }
 0x201   :  { %v1046_v30 = vadd.f32 %v3368_v37, %v1045_v15  ;;  %v2347_v14 = vpop.f32.mrb[33].mxu0 }
 0x202   :  { %v1048_v21 = vpop.f32.mrb[34].mxu0 }
 0x203   :  { %v1049_v39 = vadd.f32 %v3368_v37, %v1048_v21  ;;  %v2348_v40 = vpop.f32.mrb[35].mxu0  ;;  %v1148_v42 = vmax.f32 %v1046_v30, 0.0 }
 0x205   :  { %v1149_v0 = vmax.f32 %v1049_v39, 0.0 }
 0x207   :  { %v1178_v32 = vpack.c.bf16 %v1149_v0, %v1148_v42 }
 0x209   :  { %2438 = vmatmul.mubr.bf16.gmra.mrb[32].mxu1 %v1178_v32 }
 0x20a   :  { %2441 = vmatprep.mubr.msk.bf16.mxu1 %vm2772_vm0, %v2770_v4 }
 0x213   :  { %v1053_v51 = vpop.f32.mrb[36].mxu0 }
 0x214   :  { %v1054_v20 = vadd.f32 %v3368_v37, %v1053_v51  ;;  %v2351_v43 = vpop.f32.mrb[37].mxu0 }
 0x215   :  { %v1056_v36 = vpop.f32.mrb[38].mxu0 }
 0x216   :  { %v1057_v44 = vadd.f32 %v3368_v37, %v1056_v36  ;;  %v2352_v7 = vpop.f32.mrb[39].mxu0  ;;  %v1150_v19 = vmax.f32 %v1054_v20, 0.0 }
 0x218   :  { %v1151_v12 = vmax.f32 %v1057_v44, 0.0 }
 0x21a   :  { %v1179_v47 = vpack.c.bf16 %v1151_v12, %v1150_v19 }
 0x21c   :  { %2442 = vmatmul.mubr.bf16.gmra.mrb[36].mxu1 %v1179_v47 }
 0x21d   :  { %2445 = vmatprep.mubr.msk.bf16.mxu1 %vm2772_vm0, %v2770_v4 }
 0x226   :  { %v1061_v48 = vpop.f32.mrb[40].mxu0 }
 0x227   :  { %v1062_v41 = vadd.f32 %v3368_v37, %v1061_v48  ;;  %v2355_v52 = vpop.f32.mrb[41].mxu0 }
 0x228   :  { %v1064_v53 = vpop.f32.mrb[42].mxu0 }
 0x229   :  { %v1065_v55 = vadd.f32 %v3368_v37, %v1064_v53  ;;  %v2356_v56 = vpop.f32.mrb[43].mxu0  ;;  %v1152_v26 = vmax.f32 %v1062_v41, 0.0 }
 0x22b   :  { %v1153_v2 = vmax.f32 %v1065_v55, 0.0 }
 0x22d   :  { %v1180_v29 = vpack.c.bf16 %v1153_v2, %v1152_v26 }
 0x22f   :  { %2446 = vmatmul.mubr.bf16.gmra.mrb[40].mxu1 %v1180_v29 }
 0x230   :  { %2449 = vmatprep.mubr.msk.bf16.mxu1 %vm2772_vm0, %v2770_v4 }
 0x239   :  { %v1069_v57 = vpop.f32.mrb[44].mxu0 }
 0x23a   :  { %v1070_v58 = vadd.f32 %v3368_v37, %v1069_v57  ;;  %v2359_v60 = vpop.f32.mrb[45].mxu0 }
 0x23b   :  { %v1072_v35 = vpop.f32.mrb[46].mxu0 }
 0x23c   :  { %v1073_v59 = vadd.f32 %v3368_v37, %v1072_v35  ;;  %v2360_v61 = vpop.f32.mrb[47].mxu0  ;;  %v1154_v62 = vmax.f32 %v1070_v58, 0.0 }
 0x23e   :  { %v1155_v25 = vmax.f32 %v1073_v59, 0.0 }
 0x240   :  { %v1181_v28 = vpack.c.bf16 %v1155_v25, %v1154_v62 }
 0x242   :  { %2450 = vmatmul.mubr.bf16.gmra.mrb[44].mxu1 %v1181_v28 }
 0x243   :  { %2453 = vmatprep.mubr.msk.bf16.mxu1 %vm2772_vm0, %v2770_v4 }
 0x244   :  { %v1294_v63 = vpop.f32.mrb[0].mxu1 }
 0x245   :  { %v1295_v6 = vadd.f32 %v3533_v9, %v1294_v63  ;;  %v2407_v8 = vpop.f32.mrb[1].mxu1 }
 0x246   :  { %v1297_v10 = vpop.f32.mrb[2].mxu1 }
 0x247   :  { %v1298_v11 = vadd.f32 %v3533_v9, %v1297_v10  ;;  %v2408_v45 = vpop.f32.mrb[3].mxu1  ;;  %v1445_v22 = vmax.f32 %v1295_v6, 0.0 }
 0x249   :  { %v1446_v27 = vmax.f32 %v1298_v11, 0.0 }
 0x24b   :  { %v1483_v3 = vpack.c.bf16 %v1446_v27, %v1445_v22 }
 0x24c   :  { %v1077_v13 = vpop.f32.mrb[48].mxu0 }
 0x24d   :  { %v1078_v31 = vadd.f32 %v3368_v37, %v1077_v13  ;;  %v2363_v38 = vpop.f32.mrb[49].mxu0  ;;  %2498 = vmatmul.mubr.bf16.vlgmr.msra.gmra.mrb[76].mxu0 %v1483_v3  ;;  %v2758_v3 = vld [vmem:[%s3953_s9] sm:$0xff]  }
 0x24e   :  { %v1080_v49 = vpop.f32.mrb[50].mxu0  ;;  %2501 = vmatprep.mubr.msk.bf16.mxu0 %vm2772_vm0, %v2770_v4  ;;  %2574 = vmatpush3.bf16.msra.mxu1 %v2758_v3  ;;  %v2759_v38 = vld [vmem:[%s3953_s9 + $0x8] sm:$0xff]  }
 0x24f   :  { %v1081_v16 = vadd.f32 %v3368_v37, %v1080_v49  ;;  %v2364_v34 = vpop.f32.mrb[51].mxu0  ;;  %v1156_v50 = vmax.f32 %v1078_v31, 0.0  ;;  %2575 = vmatprep.subr.bf16.mxu1 %v2770_v4 }
 0x251   :  { %v1157_v5 = vmax.f32 %v1081_v16, 0.0  ;;  %v2760_v16 = vld [vmem:[%s3953_s9 + $0x10] sm:$0xff]  }
 0x252   :  { %2576 = vmatpush3.bf16.msra.mxu1 %v2759_v38 }
 0x253   :  { %v1182_v17 = vpack.c.bf16 %v1157_v5, %v1156_v50  ;;  %2577 = vmatprep.subr.bf16.mxu1 %v2770_v4 }
 0x255   :  { %2454 = vmatmul.mubr.bf16.gmra.mrb[48].mxu1 %v1182_v17 }
 0x256   :  { %2457 = vmatprep.mubr.msk.bf16.mxu1 %vm2772_vm0, %v2770_v4  ;;  %2578 = vmatpush3.bf16.msra.mxu1 %v2760_v16 }
 0x257   :  { %2579 = vmatprep.subr.bf16.mxu1 %v2770_v4 }
 0x25f   :  { %v1085_v54 = vpop.f32.mrb[52].mxu0  ;;  %v1302_v33 = vpop.f32.mrb[4].mxu1 }
 0x260   :  { %v1086_v18 = vadd.f32 %v3368_v37, %v1085_v54  ;;  %v1303_v23 = vadd.f32 %v3533_v9, %v1302_v33  ;;  %v2367_v1 = vpop.f32.mrb[53].mxu0  ;;  %v2411_v24 = vpop.f32.mrb[5].mxu1 }
 0x261   :  { %v1088_v46 = vpop.f32.mrb[54].mxu0  ;;  %v1305_v15 = vpop.f32.mrb[6].mxu1 }
 0x262   :  { %v1089_v30 = vadd.f32 %v3368_v37, %v1088_v46  ;;  %v1306_v14 = vadd.f32 %v3533_v9, %v1305_v15  ;;  %v2368_v21 = vpop.f32.mrb[55].mxu0  ;;  %v2412_v39 = vpop.f32.mrb[7].mxu1  ;;  %v1158_v40 = vmax.f32 %v1086_v18, 0.0  ;;  %v1447_v42 = vmax.f32 %v1303_v23, 0.0  ;;  %v2761_v18 = vld [vmem:[%s3953_s9 + $0x18] sm:$0xff]   ;;  %v2762_v15 = vld [vmem:[%s3953_s9 + $0x20] sm:$0xff]  }
 0x263   :  { %2580 = vmatpush3.bf16.msra.mxu1 %v2761_v18 }
 0x264   :  { %v1159_v0 = vmax.f32 %v1089_v30, 0.0  ;;  %v1448_v32 = vmax.f32 %v1306_v14, 0.0  ;;  %2581 = vmatprep.subr.bf16.mxu1 %v2770_v4 }
 0x266   :  { %v1183_v51 = vpack.c.bf16 %v1159_v0, %v1158_v40  ;;  %v1484_v20 = vpack.c.bf16 %v1448_v32, %v1447_v42  ;;  %v2763_v42 = vld [vmem:[%s3953_s9 + $0x28] sm:$0xff]  }
 0x267   :  { %2582 = vmatpush3.bf16.msra.mxu1 %v2762_v15 }
 0x268   :  { %2458 = vmatmul.mubr.bf16.gmra.mrb[52].mxu1 %v1183_v51  ;;  %2502 = vmatmul.mubr.bf16.gmra.mrb[80].mxu0 %v1484_v20  ;;  %v2764_v20 = vld [vmem:[%s3953_s9 + $0x30] sm:$0xff]  }
 0x269   :  { %2505 = vmatprep.mubr.msk.bf16.mxu0 %vm2772_vm0, %v2770_v4  ;;  %2461 = vmatprep.mubr.msk.bf16.mxu1 %vm2772_vm0, %v2770_v4 }
 0x26a   :  { %v1310_v43 = vpop.f32.mrb[8].mxu1  ;;  %2583 = vmatprep.subr.bf16.mxu1 %v2770_v4 }
 0x26b   :  { %v1311_v36 = vadd.f32 %v3533_v9, %v1310_v43  ;;  %v2415_v44 = vpop.f32.mrb[9].mxu1  ;;  %2584 = vmatpush3.bf16.msra.mxu1 %v2763_v42 }
 0x26c   :  { %v1313_v7 = vpop.f32.mrb[10].mxu1  ;;  %2585 = vmatprep.subr.bf16.mxu1 %v2770_v4 }
 0x26d   :  { %v1314_v19 = vadd.f32 %v3533_v9, %v1313_v7  ;;  %v2416_v12 = vpop.f32.mrb[11].mxu1  ;;  %v1449_v47 = vmax.f32 %v1311_v36, 0.0  ;;  %v2765_v7 = vld [vmem:[%s3953_s9 + $0x38] sm:$0xff]  }
 0x26f   :  { %v1450_v48 = vmax.f32 %v1314_v19, 0.0  ;;  %2586 = vmatpush3.bf16.msra.mxu1 %v2764_v20 }
 0x270   :  { %2587 = vmatprep.subr.bf16.mxu1 %v2770_v4 }
 0x271   :  { %v1485_v41 = vpack.c.bf16 %v1450_v48, %v1449_v47 }
 0x272   :  { %v1093_v52 = vpop.f32.mrb[56].mxu0 }
 0x273   :  { %v1094_v53 = vadd.f32 %v3368_v37, %v1093_v52  ;;  %v2371_v55 = vpop.f32.mrb[57].mxu0  ;;  %2506 = vmatmul.mubr.bf16.gmra.mrb[84].mxu0 %v1485_v41  ;;  %2588 = vmatpush3.bf16.msra.mxu1 %v2765_v7 }
 0x274   :  { %v1096_v56 = vpop.f32.mrb[58].mxu0  ;;  %2509 = vmatprep.mubr.msk.bf16.mxu0 %vm2772_vm0, %v2770_v4 }
 0x275   :  { %v1097_v26 = vadd.f32 %v3368_v37, %v1096_v56  ;;  %v2372_v2 = vpop.f32.mrb[59].mxu0  ;;  %v1160_v29 = vmax.f32 %v1094_v53, 0.0 }
 0x277   :  { %v1161_v57 = vmax.f32 %v1097_v26, 0.0 }
 0x279   :  { %v1184_v58 = vpack.c.bf16 %v1161_v57, %v1160_v29 }
 0x27b   :  { %2462 = vmatmul.mubr.bf16.gmra.mrb[56].mxu1 %v1184_v58 }
 0x27c   :  { %2465 = vmatprep.mubr.msk.bf16.mxu1 %vm2772_vm0, %v2770_v4 }
 0x27d   :  { %v1318_v60 = vpop.f32.mrb[12].mxu1 }
 0x27e   :  { %v1319_v35 = vadd.f32 %v3533_v9, %v1318_v60  ;;  %v2419_v59 = vpop.f32.mrb[13].mxu1 }
 0x27f   :  { %v1321_v61 = vpop.f32.mrb[14].mxu1 }
 0x280   :  { %v1322_v62 = vadd.f32 %v3533_v9, %v1321_v61  ;;  %v2420_v25 = vpop.f32.mrb[15].mxu1  ;;  %v1451_v28 = vmax.f32 %v1319_v35, 0.0 }
 0x282   :  { %v1452_v63 = vmax.f32 %v1322_v62, 0.0 }
 0x284   :  { %v1486_v6 = vpack.c.bf16 %v1452_v63, %v1451_v28 }
 0x285   :  { %v1101_v8 = vpop.f32.mrb[60].mxu0 }
 0x286   :  { %v1102_v10 = vadd.f32 %v3368_v37, %v1101_v8  ;;  %v2375_v11 = vpop.f32.mrb[61].mxu0  ;;  %2510 = vmatmul.mubr.bf16.gmra.mrb[88].mxu0 %v1486_v6 }
 0x287   :  { %v1104_v45 = vpop.f32.mrb[62].mxu0  ;;  %2513 = vmatprep.mubr.msk.bf16.mxu0 %vm2772_vm0, %v2770_v4 }
 0x288   :  { %v1105_v22 = vadd.f32 %v3368_v37, %v1104_v45  ;;  %v2376_v27 = vpop.f32.mrb[63].mxu0  ;;  %v1162_v13 = vmax.f32 %v1102_v10, 0.0  ;;  %v2767_v10 = vld [vmem:[%s3950_s4] ss:$0 sm:$0xff] }
 0x28a   :  { %v1163_v31 = vmax.f32 %v1105_v22, 0.0 }
 0x28c   :  { %v1185_v49 = vpack.c.bf16 %v1163_v31, %v1162_v13 }
 0x28e   :  { %2466 = vmatmul.mubr.bf16.gmra.mrb[60].mxu1 %v1185_v49 }
 0x28f   :  { %2469 = vmatprep.mubr.msk.bf16.mxu1 %vm2772_vm0, %v2770_v4 }
 0x290   :  { %v1326_v34 = vpop.f32.mrb[16].mxu1 }
 0x291   :  { %v1327_v50 = vadd.f32 %v3533_v9, %v1326_v34  ;;  %v2423_v5 = vpop.f32.mrb[17].mxu1 }
 0x292   :  { %v1329_v17 = vpop.f32.mrb[18].mxu1 }
 0x293   :  { %v1330_v54 = vadd.f32 %v3533_v9, %v1329_v17  ;;  %v2424_v33 = vpop.f32.mrb[19].mxu1  ;;  %v1453_v23 = vmax.f32 %v1327_v50, 0.0 }
 0x295   :  { %v1454_v1 = vmax.f32 %v1330_v54, 0.0 }
 0x297   :  { %v1487_v24 = vpack.c.bf16 %v1454_v1, %v1453_v23 }
 0x298   :  { %v1109_v46 = vpop.f32.mrb[64].mxu0 }
 0x299   :  { %v1110_v30 = vadd.f32 %v3368_v37, %v1109_v46  ;;  %v2379_v14 = vpop.f32.mrb[65].mxu0  ;;  %2514 = vmatmul.mubr.bf16.gmra.mrb[92].mxu0 %v1487_v24 }
 0x29a   :  { %v1112_v21 = vpop.f32.mrb[66].mxu0  ;;  %2517 = vmatprep.mubr.msk.bf16.mxu0 %vm2772_vm0, %v2770_v4 }
 0x29b   :  { %v1113_v39 = vadd.f32 %v3368_v37, %v1112_v21  ;;  %v2380_v40 = vpop.f32.mrb[67].mxu0  ;;  %v1164_v0 = vmax.f32 %v1110_v30, 0.0 }
 0x29d   :  { %v1165_v32 = vmax.f32 %v1113_v39, 0.0 }
 0x29f   :  { %v1186_v51 = vpack.c.bf16 %v1165_v32, %v1164_v0 }
 0x2a1   :  { %2470 = vmatmul.mubr.bf16.gmra.mrb[64].mxu1 %v1186_v51 }
 0x2a2   :  { %2473 = vmatprep.mubr.msk.bf16.mxu1 %vm2772_vm0, %v2770_v4 }
 0x2a3   :  { %v1334_v43 = vpop.f32.mrb[20].mxu1 }
 0x2a4   :  { %v1335_v36 = vadd.f32 %v3533_v9, %v1334_v43  ;;  %v2427_v44 = vpop.f32.mrb[21].mxu1 }
 0x2a5   :  { %v1337_v19 = vpop.f32.mrb[22].mxu1 }
 0x2a6   :  { %v1338_v12 = vadd.f32 %v3533_v9, %v1337_v19  ;;  %v2428_v47 = vpop.f32.mrb[23].mxu1  ;;  %v1455_v48 = vmax.f32 %v1335_v36, 0.0 }
 0x2a8   :  { %v1456_v41 = vmax.f32 %v1338_v12, 0.0 }
 0x2aa   :  { %v1488_v52 = vpack.c.bf16 %v1456_v41, %v1455_v48 }
 0x2ab   :  { %v1117_v53 = vpop.f32.mrb[68].mxu0 }
 0x2ac   :  { %v1118_v55 = vadd.f32 %v3368_v37, %v1117_v53  ;;  %v2383_v56 = vpop.f32.mrb[69].mxu0  ;;  %2518 = vmatmul.mubr.bf16.gmra.mrb[96].mxu0 %v1488_v52 }
 0x2ad   :  { %v1120_v26 = vpop.f32.mrb[70].mxu0  ;;  %2521 = vmatprep.mubr.msk.bf16.mxu0 %vm2772_vm0, %v2770_v4 }
 0x2ae   :  { %v1121_v2 = vadd.f32 %v3368_v37, %v1120_v26  ;;  %v2384_v29 = vpop.f32.mrb[71].mxu0  ;;  %v1166_v57 = vmax.f32 %v1118_v55, 0.0 }
 0x2b0   :  { %v1167_v58 = vmax.f32 %v1121_v2, 0.0 }
 0x2b2   :  { %v1187_v60 = vpack.c.bf16 %v1167_v58, %v1166_v57 }
 0x2b4   :  { %2474 = vmatmul.mubr.bf16.gmra.mrb[68].mxu1 %v1187_v60 }
 0x2b5   :  { %2477 = vmatprep.mubr.msk.bf16.mxu1 %vm2772_vm0, %v2770_v4 }
 0x2b6   :  { %v1342_v35 = vpop.f32.mrb[24].mxu1 }
 0x2b7   :  { %v1343_v59 = vadd.f32 %v3533_v9, %v1342_v35  ;;  %v2431_v61 = vpop.f32.mrb[25].mxu1 }
 0x2b8   :  { %v1345_v62 = vpop.f32.mrb[26].mxu1  ;;  %v3646_v61 = vld [vmem:[%s3954_s8] ss:$0 sm:$0xff] }
 0x2b9   :  { %v1346_v25 = vadd.f32 %v3533_v9, %v1345_v62  ;;  %v2432_v28 = vpop.f32.mrb[27].mxu1  ;;  %v1457_v63 = vmax.f32 %v1343_v59, 0.0 }
 0x2bb   :  { %v1458_v6 = vmax.f32 %v1346_v25, 0.0 }
 0x2bd   :  { %v1489_v8 = vpack.c.bf16 %v1458_v6, %v1457_v63 }
 0x2be   :  { %v1125_v37 = vpop.f32.mrb[72].mxu0 }
 0x2bf   :  { %v1126_v11 = vadd.f32 %v2767_v10, %v1125_v37  ;;  %v2387_v45 = vpop.f32.mrb[73].mxu0  ;;  %2522 = vmatmul.mubr.bf16.gmra.mrb[100].mxu0 %v1489_v8 }
 0x2c0   :  { %v1128_v22 = vpop.f32.mrb[74].mxu0  ;;  %2525 = vmatprep.mubr.msk.bf16.mxu0 %vm2772_vm0, %v2770_v4 }
 0x2c1   :  { %v1129_v27 = vadd.f32 %v2767_v10, %v1128_v22  ;;  %v2388_v3 = vpop.f32.mrb[75].mxu0  ;;  %v1168_v13 = vmax.f32 %v1126_v11, 0.0 }
 0x2c3   :  { %v1169_v31 = vmax.f32 %v1129_v27, 0.0 }
 0x2c5   :  { %v1188_v38 = vpack.c.bf16 %v1169_v31, %v1168_v13 }
 0x2c7   :  { %2478 = vmatmul.mubr.bf16.gmra.mrb[72].mxu1 %v1188_v38 }
 0x2c8   :  { %2589 = vmatprep.mubr.msk.bf16.mxu1 %vm2772_vm0, %v2770_v4 }
 0x2c9   :  { %v1350_v49 = vpop.f32.mrb[28].mxu1 }
 0x2ca   :  { %v1351_v16 = vadd.f32 %v3533_v9, %v1350_v49  ;;  %v2435_v34 = vpop.f32.mrb[29].mxu1 }
 0x2cb   :  { %v1353_v50 = vpop.f32.mrb[30].mxu1 }
 0x2cc   :  { %v1354_v5 = vadd.f32 %v3533_v9, %v1353_v50  ;;  %v2436_v17 = vpop.f32.mrb[31].mxu1  ;;  %v1459_v54 = vmax.f32 %v1351_v16, 0.0 }
 0x2ce   :  { %v1460_v33 = vmax.f32 %v1354_v5, 0.0 }
 0x2d0   :  { %v1490_v18 = vpack.c.bf16 %v1460_v33, %v1459_v54 }
 0x2d2   :  { %2526 = vmatmul.mubr.bf16.gmra.mrb[104].mxu0 %v1490_v18 }
 0x2d3   :  { %2529 = vmatprep.mubr.msk.bf16.mxu0 %vm2772_vm0, %v2770_v4 }
 0x2dc   :  { %v1358_v23 = vpop.f32.mrb[32].mxu1 }
 0x2dd   :  { %v1359_v1 = vadd.f32 %v3533_v9, %v1358_v23  ;;  %v2439_v24 = vpop.f32.mrb[33].mxu1 }
 0x2de   :  { %v1361_v46 = vpop.f32.mrb[34].mxu1 }
 0x2df   :  { %v1362_v15 = vadd.f32 %v3533_v9, %v1361_v46  ;;  %v2440_v30 = vpop.f32.mrb[35].mxu1  ;;  %v1461_v14 = vmax.f32 %v1359_v1, 0.0 }
 0x2e1   :  { %v1462_v21 = vmax.f32 %v1362_v15, 0.0 }
 0x2e3   :  { %v1491_v39 = vpack.c.bf16 %v1462_v21, %v1461_v14 }
 0x2e5   :  { %2530 = vmatmul.mubr.bf16.gmra.mrb[108].mxu0 %v1491_v39 }
 0x2e6   :  { %2533 = vmatprep.mubr.msk.bf16.mxu0 %vm2772_vm0, %v2770_v4 }
 0x2ef   :  { %v1366_v40 = vpop.f32.mrb[36].mxu1 }
 0x2f0   :  { %v1367_v42 = vadd.f32 %v3533_v9, %v1366_v40  ;;  %v2443_v0 = vpop.f32.mrb[37].mxu1 }
 0x2f1   :  { %v1369_v32 = vpop.f32.mrb[38].mxu1 }
 0x2f2   :  { %v1370_v51 = vadd.f32 %v3533_v9, %v1369_v32  ;;  %v2444_v20 = vpop.f32.mrb[39].mxu1  ;;  %v1463_v43 = vmax.f32 %v1367_v42, 0.0 }
 0x2f4   :  { %v1464_v36 = vmax.f32 %v1370_v51, 0.0 }
 0x2f6   :  { %v1492_v44 = vpack.c.bf16 %v1464_v36, %v1463_v43 }
 0x2f8   :  { %2534 = vmatmul.mubr.bf16.gmra.mrb[112].mxu0 %v1492_v44 }
 0x2f9   :  { %2537 = vmatprep.mubr.msk.bf16.mxu0 %vm2772_vm0, %v2770_v4 }
 0x302   :  { %v1374_v7 = vpop.f32.mrb[40].mxu1 }
 0x303   :  { %v1375_v19 = vadd.f32 %v3533_v9, %v1374_v7  ;;  %v2447_v12 = vpop.f32.mrb[41].mxu1 }
 0x304   :  { %v1377_v47 = vpop.f32.mrb[42].mxu1 }
 0x305   :  { %v1378_v48 = vadd.f32 %v3533_v9, %v1377_v47  ;;  %v2448_v41 = vpop.f32.mrb[43].mxu1  ;;  %v1465_v52 = vmax.f32 %v1375_v19, 0.0 }
 0x307   :  { %v1466_v53 = vmax.f32 %v1378_v48, 0.0 }
 0x309   :  { %v1493_v55 = vpack.c.bf16 %v1466_v53, %v1465_v52 }
 0x30b   :  { %2538 = vmatmul.mubr.bf16.gmra.mrb[116].mxu0 %v1493_v55 }
 0x30c   :  { %2541 = vmatprep.mubr.msk.bf16.mxu0 %vm2772_vm0, %v2770_v4 }
 0x315   :  { %v1382_v56 = vpop.f32.mrb[44].mxu1 }
 0x316   :  { %v1383_v26 = vadd.f32 %v3533_v9, %v1382_v56  ;;  %v2451_v2 = vpop.f32.mrb[45].mxu1 }
 0x317   :  { %v1385_v29 = vpop.f32.mrb[46].mxu1 }
 0x318   :  { %v1386_v57 = vadd.f32 %v3533_v9, %v1385_v29  ;;  %v2452_v58 = vpop.f32.mrb[47].mxu1  ;;  %v1467_v60 = vmax.f32 %v1383_v26, 0.0 }
 0x31a   :  { %v1468_v35 = vmax.f32 %v1386_v57, 0.0 }
 0x31c   :  { %v1494_v59 = vpack.c.bf16 %v1468_v35, %v1467_v60 }
 0x31e   :  { %2542 = vmatmul.mubr.bf16.gmra.mrb[120].mxu0 %v1494_v59 }
 0x31f   :  { %2545 = vmatprep.mubr.msk.bf16.mxu0 %vm2772_vm0, %v2770_v4 }
 0x320   :  { %v1607_v62 = vpop.f32.mrb[76].mxu0 }
 0x321   :  { %v1608_v25 = vadd.f32 %v3646_v61, %v1607_v62  ;;  %v2499_v28 = vpop.f32.mrb[77].mxu0 }
 0x322   :  { %v1610_v63 = vpop.f32.mrb[78].mxu0 }
 0x323   :  { %v1611_v6 = vadd.f32 %v3646_v61, %v1610_v63  ;;  %v2500_v8 = vpop.f32.mrb[79].mxu0  ;;  %v1758_v37 = vmax.f32 %v1608_v25, 0.0 }
 0x325   :  { %v1759_v10 = vmax.f32 %v1611_v6, 0.0 }
 0x327   :  { %v1796_v11 = vpack.c.bf16 %v1759_v10, %v1758_v37 }
 0x328   :  { %v1390_v45 = vpop.f32.mrb[48].mxu1 }
 0x329   :  { %v1391_v22 = vadd.f32 %v3533_v9, %v1390_v45  ;;  %v2455_v27 = vpop.f32.mrb[49].mxu1  ;;  %2590 = vmatmul.mubr.bf16.vlgmr.msra.gmra.mrb[76].mxu1 %v1796_v11 }
 0x32a   :  { %v1393_v3 = vpop.f32.mrb[50].mxu1  ;;  %2593 = vmatprep.mubr.msk.bf16.mxu1 %vm2772_vm0, %v2770_v4 }
 0x32b   :  { %v1394_v13 = vadd.f32 %v3533_v9, %v1393_v3  ;;  %v2456_v31 = vpop.f32.mrb[51].mxu1  ;;  %v1469_v38 = vmax.f32 %v1391_v22, 0.0 }
 0x32d   :  { %v1470_v49 = vmax.f32 %v1394_v13, 0.0 }
 0x32f   :  { %v1495_v16 = vpack.c.bf16 %v1470_v49, %v1469_v38 }
 0x331   :  { %2546 = vmatmul.mubr.bf16.gmra.mrb[124].mxu0 %v1495_v16 }
 0x332   :  { %2549 = vmatprep.mubr.msk.bf16.mxu0 %vm2772_vm0, %v2770_v4 }
 0x33b   :  { %v1398_v34 = vpop.f32.mrb[52].mxu1  ;;  %v1615_v50 = vpop.f32.mrb[80].mxu0 }
 0x33c   :  { %v1399_v5 = vadd.f32 %v3533_v9, %v1398_v34  ;;  %v1616_v17 = vadd.f32 %v3646_v61, %v1615_v50  ;;  %v2459_v54 = vpop.f32.mrb[53].mxu1  ;;  %v2503_v33 = vpop.f32.mrb[81].mxu0 }
 0x33d   :  { %v1401_v18 = vpop.f32.mrb[54].mxu1  ;;  %v1618_v23 = vpop.f32.mrb[82].mxu0 }
 0x33e   :  { %v1402_v1 = vadd.f32 %v3533_v9, %v1401_v18  ;;  %v1619_v24 = vadd.f32 %v3646_v61, %v1618_v23  ;;  %v2460_v46 = vpop.f32.mrb[55].mxu1  ;;  %v2504_v15 = vpop.f32.mrb[83].mxu0  ;;  %v1471_v30 = vmax.f32 %v1399_v5, 0.0  ;;  %v1760_v14 = vmax.f32 %v1616_v17, 0.0 }
 0x340   :  { %v1472_v21 = vmax.f32 %v1402_v1, 0.0  ;;  %v1761_v39 = vmax.f32 %v1619_v24, 0.0 }
 0x342   :  { %v1496_v40 = vpack.c.bf16 %v1472_v21, %v1471_v30  ;;  %v1797_v42 = vpack.c.bf16 %v1761_v39, %v1760_v14 }
 0x344   :  { %2550 = vmatmul.mubr.bf16.gmra.mrb[128].mxu0 %v1496_v40  ;;  %2594 = vmatmul.mubr.bf16.gmra.mrb[80].mxu1 %v1797_v42 }
 0x345   :  { %2597 = vmatprep.mubr.msk.bf16.mxu1 %vm2772_vm0, %v2770_v4  ;;  %2553 = vmatprep.mubr.msk.bf16.mxu0 %vm2772_vm0, %v2770_v4 }
 0x346   :  { %v1623_v0 = vpop.f32.mrb[84].mxu0 }
 0x347   :  { %v1624_v32 = vadd.f32 %v3646_v61, %v1623_v0  ;;  %v2507_v51 = vpop.f32.mrb[85].mxu0 }
 0x348   :  { %v1626_v20 = vpop.f32.mrb[86].mxu0 }
 0x349   :  { %v1627_v43 = vadd.f32 %v3646_v61, %v1626_v20  ;;  %v2508_v36 = vpop.f32.mrb[87].mxu0  ;;  %v1762_v44 = vmax.f32 %v1624_v32, 0.0 }
 0x34b   :  { %v1763_v7 = vmax.f32 %v1627_v43, 0.0 }
 0x34d   :  { %v1798_v19 = vpack.c.bf16 %v1763_v7, %v1762_v44 }
 0x34e   :  { %v1406_v12 = vpop.f32.mrb[56].mxu1 }
 0x34f   :  { %v1407_v47 = vadd.f32 %v3533_v9, %v1406_v12  ;;  %v2463_v48 = vpop.f32.mrb[57].mxu1  ;;  %2598 = vmatmul.mubr.bf16.gmra.mrb[84].mxu1 %v1798_v19 }
 0x350   :  { %v1409_v41 = vpop.f32.mrb[58].mxu1  ;;  %2601 = vmatprep.mubr.msk.bf16.mxu1 %vm2772_vm0, %v2770_v4 }
 0x351   :  { %v1410_v52 = vadd.f32 %v3533_v9, %v1409_v41  ;;  %v2464_v53 = vpop.f32.mrb[59].mxu1  ;;  %v1473_v55 = vmax.f32 %v1407_v47, 0.0 }
 0x353   :  { %v1474_v56 = vmax.f32 %v1410_v52, 0.0 }
 0x355   :  { %v1497_v26 = vpack.c.bf16 %v1474_v56, %v1473_v55 }
 0x357   :  { %2554 = vmatmul.mubr.bf16.gmra.mrb[132].mxu0 %v1497_v26 }
 0x358   :  { %2557 = vmatprep.mubr.msk.bf16.mxu0 %vm2772_vm0, %v2770_v4 }
 0x359   :  { %v1631_v2 = vpop.f32.mrb[88].mxu0 }
 0x35a   :  { %v1632_v29 = vadd.f32 %v3646_v61, %v1631_v2  ;;  %v2511_v57 = vpop.f32.mrb[89].mxu0 }
 0x35b   :  { %v1634_v58 = vpop.f32.mrb[90].mxu0 }
 0x35c   :  { %v1635_v60 = vadd.f32 %v3646_v61, %v1634_v58  ;;  %v2512_v35 = vpop.f32.mrb[91].mxu0  ;;  %v1764_v59 = vmax.f32 %v1632_v29, 0.0 }
 0x35e   :  { %v1765_v62 = vmax.f32 %v1635_v60, 0.0 }
 0x360   :  { %v1799_v25 = vpack.c.bf16 %v1765_v62, %v1764_v59 }
 0x361   :  { %v1414_v28 = vpop.f32.mrb[60].mxu1 }
 0x362   :  { %v1415_v63 = vadd.f32 %v3533_v9, %v1414_v28  ;;  %v2467_v6 = vpop.f32.mrb[61].mxu1  ;;  %2602 = vmatmul.mubr.bf16.gmra.mrb[88].mxu1 %v1799_v25 }
 0x363   :  { %v1417_v8 = vpop.f32.mrb[62].mxu1  ;;  %2605 = vmatprep.mubr.msk.bf16.mxu1 %vm2772_vm0, %v2770_v4 }
 0x364   :  { %v1418_v37 = vadd.f32 %v3533_v9, %v1417_v8  ;;  %v2468_v10 = vpop.f32.mrb[63].mxu1  ;;  %v1475_v11 = vmax.f32 %v1415_v63, 0.0 }
 0x366   :  { %v1476_v45 = vmax.f32 %v1418_v37, 0.0 }
 0x368   :  { %v1498_v22 = vpack.c.bf16 %v1476_v45, %v1475_v11 }
 0x36a   :  { %2558 = vmatmul.mubr.bf16.gmra.mrb[136].mxu0 %v1498_v22 }
 0x36b   :  { %2561 = vmatprep.mubr.msk.bf16.mxu0 %vm2772_vm0, %v2770_v4 }
 0x36c   :  { %v1639_v27 = vpop.f32.mrb[92].mxu0 }
 0x36d   :  { %v1640_v3 = vadd.f32 %v3646_v61, %v1639_v27  ;;  %v2515_v13 = vpop.f32.mrb[93].mxu0 }
 0x36e   :  { %v1642_v31 = vpop.f32.mrb[94].mxu0 }
 0x36f   :  { %v1643_v38 = vadd.f32 %v3646_v61, %v1642_v31  ;;  %v2516_v49 = vpop.f32.mrb[95].mxu0  ;;  %v1766_v16 = vmax.f32 %v1640_v3, 0.0 }
 0x371   :  { %v1767_v34 = vmax.f32 %v1643_v38, 0.0 }
 0x373   :  { %v1800_v50 = vpack.c.bf16 %v1767_v34, %v1766_v16 }
 0x374   :  { %v1422_v5 = vpop.f32.mrb[64].mxu1 }
 0x375   :  { %v1423_v17 = vadd.f32 %v3533_v9, %v1422_v5  ;;  %v2471_v54 = vpop.f32.mrb[65].mxu1  ;;  %2606 = vmatmul.mubr.bf16.gmra.mrb[92].mxu1 %v1800_v50 }
 0x376   :  { %v1425_v33 = vpop.f32.mrb[66].mxu1  ;;  %2609 = vmatprep.mubr.msk.bf16.mxu1 %vm2772_vm0, %v2770_v4 }
 0x377   :  { %v1426_v18 = vadd.f32 %v3533_v9, %v1425_v33  ;;  %v2472_v23 = vpop.f32.mrb[67].mxu1  ;;  %v1477_v1 = vmax.f32 %v1423_v17, 0.0 }
 0x379   :  { %v1478_v24 = vmax.f32 %v1426_v18, 0.0 }
 0x37b   :  { %v1499_v46 = vpack.c.bf16 %v1478_v24, %v1477_v1 }
 0x37d   :  { %2562 = vmatmul.mubr.bf16.gmra.mrb[140].mxu0 %v1499_v46 }
 0x37e   :  { %2565 = vmatprep.mubr.msk.bf16.mxu0 %vm2772_vm0, %v2770_v4 }
 0x37f   :  { %v1647_v15 = vpop.f32.mrb[96].mxu0 }
 0x380   :  { %v1648_v30 = vadd.f32 %v3646_v61, %v1647_v15  ;;  %v2519_v14 = vpop.f32.mrb[97].mxu0 }
 0x381   :  { %v1650_v21 = vpop.f32.mrb[98].mxu0 }
 0x382   :  { %v1651_v39 = vadd.f32 %v3646_v61, %v1650_v21  ;;  %v2520_v40 = vpop.f32.mrb[99].mxu0  ;;  %v1768_v42 = vmax.f32 %v1648_v30, 0.0 }
 0x384   :  { %v1769_v0 = vmax.f32 %v1651_v39, 0.0 }
 0x386   :  { %v1801_v32 = vpack.c.bf16 %v1769_v0, %v1768_v42 }
 0x387   :  { %v1430_v51 = vpop.f32.mrb[68].mxu1 }
 0x388   :  { %v1431_v20 = vadd.f32 %v3533_v9, %v1430_v51  ;;  %v2475_v43 = vpop.f32.mrb[69].mxu1  ;;  %2610 = vmatmul.mubr.bf16.gmra.mrb[96].mxu1 %v1801_v32 }
 0x389   :  { %v1433_v36 = vpop.f32.mrb[70].mxu1  ;;  %2613 = vmatprep.mubr.msk.bf16.mxu1 %vm2772_vm0, %v2770_v4 }
 0x38a   :  { %v1434_v44 = vadd.f32 %v3533_v9, %v1433_v36  ;;  %v2476_v7 = vpop.f32.mrb[71].mxu1  ;;  %v1479_v19 = vmax.f32 %v1431_v20, 0.0 }
 0x38c   :  { %v1480_v12 = vmax.f32 %v1434_v44, 0.0 }
 0x38e   :  { %v1500_v47 = vpack.c.bf16 %v1480_v12, %v1479_v19 }
 0x390   :  { %2566 = vmatmul.mubr.bf16.gmra.mrb[144].mxu0 %v1500_v47 }
 0x391   :  { %2569 = vmatprep.mubr.msk.bf16.mxu0 %vm2772_vm0, %v2770_v4 }
 0x392   :  { %v1655_v48 = vpop.f32.mrb[100].mxu0 }
 0x393   :  { %v1656_v41 = vadd.f32 %v3646_v61, %v1655_v48  ;;  %v2523_v52 = vpop.f32.mrb[101].mxu0 }
 0x394   :  { %v1658_v53 = vpop.f32.mrb[102].mxu0 }
 0x395   :  { %v1659_v55 = vadd.f32 %v3646_v61, %v1658_v53  ;;  %v2524_v56 = vpop.f32.mrb[103].mxu0  ;;  %v1770_v26 = vmax.f32 %v1656_v41, 0.0  ;;  %v3725_v41 = vld [vmem:[%s3955_s10] ss:$0 sm:$0xff] }
 0x397   :  { %v1771_v2 = vmax.f32 %v1659_v55, 0.0 }
 0x399   :  { %v1802_v29 = vpack.c.bf16 %v1771_v2, %v1770_v26 }
 0x39a   :  { %v1438_v57 = vpop.f32.mrb[72].mxu1 }
 0x39b   :  { %v1439_v58 = vadd.f32 %v3533_v9, %v1438_v57  ;;  %v2479_v60 = vpop.f32.mrb[73].mxu1  ;;  %2614 = vmatmul.mubr.bf16.gmra.mrb[100].mxu1 %v1802_v29 }
 0x39c   :  { %v1441_v35 = vpop.f32.mrb[74].mxu1  ;;  %2617 = vmatprep.mubr.msk.bf16.mxu1 %vm2772_vm0, %v2770_v4 }
 0x39d   :  { %v1442_v59 = vadd.f32 %v3533_v9, %v1441_v35  ;;  %v2480_v62 = vpop.f32.mrb[75].mxu1  ;;  %v1481_v25 = vmax.f32 %v1439_v58, 0.0 }
 0x39f   :  { %v1482_v28 = vmax.f32 %v1442_v59, 0.0 }
 0x3a1   :  { %v1501_v63 = vpack.c.bf16 %v1482_v28, %v1481_v25 }
 0x3a3   :  { %2570 = vmatmul.mubr.bf16.gmra.mrb[148].mxu0 %v1501_v63 }
 0x3a5   :  { %v1663_v6 = vpop.f32.mrb[104].mxu0 }
 0x3a6   :  { %v1664_v8 = vadd.f32 %v3646_v61, %v1663_v6  ;;  %v2527_v37 = vpop.f32.mrb[105].mxu0 }
 0x3a7   :  { %v1666_v10 = vpop.f32.mrb[106].mxu0 }
 0x3a8   :  { %v1667_v11 = vadd.f32 %v3646_v61, %v1666_v10  ;;  %v2528_v45 = vpop.f32.mrb[107].mxu0  ;;  %v1772_v22 = vmax.f32 %v1664_v8, 0.0 }
 0x3aa   :  { %v1773_v27 = vmax.f32 %v1667_v11, 0.0 }
 0x3ac   :  { %v1803_v3 = vpack.c.bf16 %v1773_v27, %v1772_v22 }
 0x3ae   :  { %2618 = vmatmul.mubr.bf16.gmra.mrb[104].mxu1 %v1803_v3 }
 0x3af   :  { %2621 = vmatprep.mubr.msk.bf16.mxu1 %vm2772_vm0, %v2770_v4 }
 0x3b8   :  { %v1671_v9 = vpop.f32.mrb[108].mxu0 }
 0x3b9   :  { %v1672_v13 = vadd.f32 %v3646_v61, %v1671_v9  ;;  %v2531_v31 = vpop.f32.mrb[109].mxu0 }
 0x3ba   :  { %v1674_v38 = vpop.f32.mrb[110].mxu0 }
 0x3bb   :  { %v1675_v49 = vadd.f32 %v3646_v61, %v1674_v38  ;;  %v2532_v16 = vpop.f32.mrb[111].mxu0  ;;  %v1774_v34 = vmax.f32 %v1672_v13, 0.0 }
 0x3bd   :  { %v1775_v50 = vmax.f32 %v1675_v49, 0.0 }
 0x3bf   :  { %v1804_v5 = vpack.c.bf16 %v1775_v50, %v1774_v34 }
 0x3c1   :  { %2622 = vmatmul.mubr.bf16.gmra.mrb[108].mxu1 %v1804_v5 }
 0x3c2   :  { %2625 = vmatprep.mubr.msk.bf16.mxu1 %vm2772_vm0, %v2770_v4 }
 0x3cb   :  { %v1679_v17 = vpop.f32.mrb[112].mxu0 }
 0x3cc   :  { %v1680_v54 = vadd.f32 %v3646_v61, %v1679_v17  ;;  %v2535_v33 = vpop.f32.mrb[113].mxu0 }
 0x3cd   :  { %v1682_v18 = vpop.f32.mrb[114].mxu0 }
 0x3ce   :  { %v1683_v23 = vadd.f32 %v3646_v61, %v1682_v18  ;;  %v2536_v1 = vpop.f32.mrb[115].mxu0  ;;  %v1776_v24 = vmax.f32 %v1680_v54, 0.0 }
 0x3d0   :  { %v1777_v46 = vmax.f32 %v1683_v23, 0.0 }
 0x3d2   :  { %v1805_v15 = vpack.c.bf16 %v1777_v46, %v1776_v24 }
 0x3d4   :  { %2626 = vmatmul.mubr.bf16.gmra.mrb[112].mxu1 %v1805_v15 }
 0x3d5   :  { %2629 = vmatprep.mubr.msk.bf16.mxu1 %vm2772_vm0, %v2770_v4 }
 0x3de   :  { %v1687_v30 = vpop.f32.mrb[116].mxu0 }
 0x3df   :  { %v1688_v14 = vadd.f32 %v3646_v61, %v1687_v30  ;;  %v2539_v21 = vpop.f32.mrb[117].mxu0 }
 0x3e0   :  { %v1690_v39 = vpop.f32.mrb[118].mxu0 }
 0x3e1   :  { %v1691_v40 = vadd.f32 %v3646_v61, %v1690_v39  ;;  %v2540_v42 = vpop.f32.mrb[119].mxu0  ;;  %v1778_v0 = vmax.f32 %v1688_v14, 0.0 }
 0x3e3   :  { %v1779_v32 = vmax.f32 %v1691_v40, 0.0 }
 0x3e5   :  { %v1806_v51 = vpack.c.bf16 %v1779_v32, %v1778_v0 }
 0x3e7   :  { %2630 = vmatmul.mubr.bf16.gmra.mrb[116].mxu1 %v1806_v51 }
 0x3e8   :  { %2633 = vmatprep.mubr.msk.bf16.mxu1 %vm2772_vm0, %v2770_v4 }
 0x3f1   :  { %v1695_v20 = vpop.f32.mrb[120].mxu0 }
 0x3f2   :  { %v1696_v43 = vadd.f32 %v3646_v61, %v1695_v20  ;;  %v2543_v36 = vpop.f32.mrb[121].mxu0 }
 0x3f3   :  { %v1698_v44 = vpop.f32.mrb[122].mxu0 }
 0x3f4   :  { %v1699_v7 = vadd.f32 %v3646_v61, %v1698_v44  ;;  %v2544_v19 = vpop.f32.mrb[123].mxu0  ;;  %v1780_v12 = vmax.f32 %v1696_v43, 0.0 }
 0x3f6   :  { %v1781_v47 = vmax.f32 %v1699_v7, 0.0 }
 0x3f8   :  { %v1807_v48 = vpack.c.bf16 %v1781_v47, %v1780_v12 }
 0x3fa   :  { %2634 = vmatmul.mubr.bf16.gmra.mrb[120].mxu1 %v1807_v48 }
 0x3fb   :  { %2637 = vmatprep.mubr.msk.bf16.mxu1 %vm2772_vm0, %v2770_v4 }
 0x3fc   :  { %v1913_v52 = vpop.f32.mrb[76].mxu1 }
 0x3fd   :  { %v2071_v53 = vadd.f32 %v3725_v41, %v1913_v52  ;;  %v2591_v55 = vpop.f32.mrb[77].mxu1 }
 0x3fe   :  { %v1916_v56 = vpop.f32.mrb[78].mxu1 }
 0x3ff   :  { %2110 = vst.msk [vmem:[%s3956_s11] sm:$0xff] %vm2109_vm1, %v2071_v53  ;;  %v2072_v26 = vadd.f32 %v3725_v41, %v1916_v56  ;;  %v2592_v2 = vpop.f32.mrb[79].mxu1 }
 0x401   :  { %2111 = vst.msk [vmem:[%s3956_s11 + $0x8] sm:$0xff] %vm2109_vm1, %v2072_v26 }
 0x404   :  { %v1703_v29 = vpop.f32.mrb[124].mxu0 }
 0x405   :  { %v1704_v57 = vadd.f32 %v3646_v61, %v1703_v29  ;;  %v2547_v58 = vpop.f32.mrb[125].mxu0 }
 0x406   :  { %v1706_v60 = vpop.f32.mrb[126].mxu0 }
 0x407   :  { %v1707_v35 = vadd.f32 %v3646_v61, %v1706_v60  ;;  %v2548_v59 = vpop.f32.mrb[127].mxu0  ;;  %v1782_v62 = vmax.f32 %v1704_v57, 0.0 }
 0x409   :  { %v1783_v25 = vmax.f32 %v1707_v35, 0.0 }
 0x40b   :  { %v1808_v28 = vpack.c.bf16 %v1783_v25, %v1782_v62 }
 0x40d   :  { %2638 = vmatmul.mubr.bf16.gmra.mrb[124].mxu1 %v1808_v28 }
 0x40e   :  { %2641 = vmatprep.mubr.msk.bf16.mxu1 %vm2772_vm0, %v2770_v4 }
 0x417   :  { %v1711_v63 = vpop.f32.mrb[128].mxu0  ;;  %v1921_v6 = vpop.f32.mrb[80].mxu1 }
 0x418   :  { %v1712_v8 = vadd.f32 %v3646_v61, %v1711_v63  ;;  %v2073_v37 = vadd.f32 %v3725_v41, %v1921_v6  ;;  %v2551_v10 = vpop.f32.mrb[129].mxu0  ;;  %v2595_v11 = vpop.f32.mrb[81].mxu1 }
 0x419   :  { %v1714_v45 = vpop.f32.mrb[130].mxu0  ;;  %v1924_v22 = vpop.f32.mrb[82].mxu1 }
 0x41a   :  { %2112 = vst.msk [vmem:[%s3956_s11 + $0x10] sm:$0xff] %vm2109_vm1, %v2073_v37  ;;  %v1715_v27 = vadd.f32 %v3646_v61, %v1714_v45  ;;  %v2074_v3 = vadd.f32 %v3725_v41, %v1924_v22  ;;  %v2552_v9 = vpop.f32.mrb[131].mxu0  ;;  %v2596_v13 = vpop.f32.mrb[83].mxu1  ;;  %v1784_v31 = vmax.f32 %v1712_v8, 0.0 }
 0x41c   :  { %v1785_v38 = vmax.f32 %v1715_v27, 0.0  ;;  %2113 = vst.msk [vmem:[%s3956_s11 + $0x18] sm:$0xff] %vm2109_vm1, %v2074_v3 }
 0x41e   :  { %v1809_v49 = vpack.c.bf16 %v1785_v38, %v1784_v31 }
 0x420   :  { %2642 = vmatmul.mubr.bf16.gmra.mrb[128].mxu1 %v1809_v49 }
 0x421   :  { %2645 = vmatprep.mubr.msk.bf16.mxu1 %vm2772_vm0, %v2770_v4 }
 0x422   :  { %v1929_v16 = vpop.f32.mrb[84].mxu1 }
 0x423   :  { %v2075_v34 = vadd.f32 %v3725_v41, %v1929_v16  ;;  %v2599_v50 = vpop.f32.mrb[85].mxu1 }
 0x424   :  { %v1932_v5 = vpop.f32.mrb[86].mxu1 }
 0x425   :  { %2114 = vst.msk [vmem:[%s3956_s11 + $0x20] sm:$0xff] %vm2109_vm1, %v2075_v34  ;;  %v2076_v17 = vadd.f32 %v3725_v41, %v1932_v5  ;;  %v2600_v54 = vpop.f32.mrb[87].mxu1 }
 0x427   :  { %2115 = vst.msk [vmem:[%s3956_s11 + $0x28] sm:$0xff] %vm2109_vm1, %v2076_v17 }
 0x42a   :  { %v1719_v33 = vpop.f32.mrb[132].mxu0 }
 0x42b   :  { %v1720_v18 = vadd.f32 %v3646_v61, %v1719_v33  ;;  %v2555_v23 = vpop.f32.mrb[133].mxu0 }
 0x42c   :  { %v1722_v1 = vpop.f32.mrb[134].mxu0 }
 0x42d   :  { %v1723_v24 = vadd.f32 %v3646_v61, %v1722_v1  ;;  %v2556_v46 = vpop.f32.mrb[135].mxu0  ;;  %v1786_v15 = vmax.f32 %v1720_v18, 0.0 }
 0x42f   :  { %v1787_v30 = vmax.f32 %v1723_v24, 0.0 }
 0x431   :  { %v1810_v14 = vpack.c.bf16 %v1787_v30, %v1786_v15 }
 0x433   :  { %2646 = vmatmul.mubr.bf16.gmra.mrb[132].mxu1 %v1810_v14 }
 0x434   :  { %2649 = vmatprep.mubr.msk.bf16.mxu1 %vm2772_vm0, %v2770_v4 }
 0x435   :  { %v1937_v21 = vpop.f32.mrb[88].mxu1 }
 0x436   :  { %v2077_v39 = vadd.f32 %v3725_v41, %v1937_v21  ;;  %v2603_v40 = vpop.f32.mrb[89].mxu1 }
 0x437   :  { %v1940_v42 = vpop.f32.mrb[90].mxu1 }
 0x438   :  { %2116 = vst.msk [vmem:[%s3956_s11 + $0x30] sm:$0xff] %vm2109_vm1, %v2077_v39  ;;  %v2078_v0 = vadd.f32 %v3725_v41, %v1940_v42  ;;  %v2604_v32 = vpop.f32.mrb[91].mxu1 }
 0x43a   :  { %2117 = vst.msk [vmem:[%s3956_s11 + $0x38] sm:$0xff] %vm2109_vm1, %v2078_v0 }
 0x43d   :  { %v1727_v51 = vpop.f32.mrb[136].mxu0 }
 0x43e   :  { %v1728_v20 = vadd.f32 %v3646_v61, %v1727_v51  ;;  %v2559_v43 = vpop.f32.mrb[137].mxu0 }
 0x43f   :  { %v1730_v36 = vpop.f32.mrb[138].mxu0 }
 0x440   :  { %v1731_v44 = vadd.f32 %v3646_v61, %v1730_v36  ;;  %v2560_v7 = vpop.f32.mrb[139].mxu0  ;;  %v1788_v19 = vmax.f32 %v1728_v20, 0.0 }
 0x442   :  { %v1789_v12 = vmax.f32 %v1731_v44, 0.0 }
 0x444   :  { %v1811_v47 = vpack.c.bf16 %v1789_v12, %v1788_v19 }
 0x446   :  { %2650 = vmatmul.mubr.bf16.gmra.mrb[136].mxu1 %v1811_v47 }
 0x447   :  { %2653 = vmatprep.mubr.msk.bf16.mxu1 %vm2772_vm0, %v2770_v4 }
 0x448   :  { %v1945_v48 = vpop.f32.mrb[92].mxu1 }
 0x449   :  { %v2079_v52 = vadd.f32 %v3725_v41, %v1945_v48  ;;  %v2607_v53 = vpop.f32.mrb[93].mxu1 }
 0x44a   :  { %v1948_v55 = vpop.f32.mrb[94].mxu1 }
 0x44b   :  { %2118 = vst.msk [vmem:[%s3956_s11 + $0x40] sm:$0xff] %vm2109_vm1, %v2079_v52  ;;  %v2080_v56 = vadd.f32 %v3725_v41, %v1948_v55  ;;  %v2608_v26 = vpop.f32.mrb[95].mxu1 }
 0x44d   :  { %2119 = vst.msk [vmem:[%s3956_s11 + $0x48] sm:$0xff] %vm2109_vm1, %v2080_v56 }
 0x450   :  { %v1735_v2 = vpop.f32.mrb[140].mxu0 }
 0x451   :  { %v1736_v29 = vadd.f32 %v3646_v61, %v1735_v2  ;;  %v2563_v57 = vpop.f32.mrb[141].mxu0 }
 0x452   :  { %v1738_v58 = vpop.f32.mrb[142].mxu0 }
 0x453   :  { %v1739_v60 = vadd.f32 %v3646_v61, %v1738_v58  ;;  %v2564_v35 = vpop.f32.mrb[143].mxu0  ;;  %v1790_v59 = vmax.f32 %v1736_v29, 0.0 }
 0x455   :  { %v1791_v62 = vmax.f32 %v1739_v60, 0.0 }
 0x457   :  { %v1812_v25 = vpack.c.bf16 %v1791_v62, %v1790_v59 }
 0x459   :  { %2654 = vmatmul.mubr.bf16.gmra.mrb[140].mxu1 %v1812_v25 }
 0x45a   :  { %2657 = vmatprep.mubr.msk.bf16.mxu1 %vm2772_vm0, %v2770_v4 }
 0x45b   :  { %v1953_v28 = vpop.f32.mrb[96].mxu1 }
 0x45c   :  { %v2081_v63 = vadd.f32 %v3725_v41, %v1953_v28  ;;  %v2611_v6 = vpop.f32.mrb[97].mxu1 }
 0x45d   :  { %v1956_v8 = vpop.f32.mrb[98].mxu1 }
 0x45e   :  { %2120 = vst.msk [vmem:[%s3956_s11 + $0x50] sm:$0xff] %vm2109_vm1, %v2081_v63  ;;  %v2082_v37 = vadd.f32 %v3725_v41, %v1956_v8  ;;  %v2612_v10 = vpop.f32.mrb[99].mxu1 }
 0x460   :  { %2121 = vst.msk [vmem:[%s3956_s11 + $0x58] sm:$0xff] %vm2109_vm1, %v2082_v37 }
 0x463   :  { %v1743_v11 = vpop.f32.mrb[144].mxu0 }
 0x464   :  { %v1744_v45 = vadd.f32 %v3646_v61, %v1743_v11  ;;  %v2567_v22 = vpop.f32.mrb[145].mxu0 }
 0x465   :  { %v1746_v27 = vpop.f32.mrb[146].mxu0 }
 0x466   :  { %v1747_v3 = vadd.f32 %v3646_v61, %v1746_v27  ;;  %v2568_v9 = vpop.f32.mrb[147].mxu0  ;;  %v1792_v13 = vmax.f32 %v1744_v45, 0.0 }
 0x468   :  { %v1793_v31 = vmax.f32 %v1747_v3, 0.0 }
 0x46a   :  { %v1813_v38 = vpack.c.bf16 %v1793_v31, %v1792_v13 }
 0x46c   :  { %2658 = vmatmul.mubr.bf16.gmra.mrb[144].mxu1 %v1813_v38 }
 0x46d   :  { %2661 = vmatprep.mubr.msk.bf16.mxu1 %vm2772_vm0, %v2770_v4 }
 0x46e   :  { %v1961_v49 = vpop.f32.mrb[100].mxu1 }
 0x46f   :  { %v2083_v16 = vadd.f32 %v3725_v41, %v1961_v49  ;;  %v2615_v34 = vpop.f32.mrb[101].mxu1 }
 0x470   :  { %v1964_v50 = vpop.f32.mrb[102].mxu1 }
 0x471   :  { %2122 = vst.msk [vmem:[%s3956_s11 + $0x60] sm:$0xff] %vm2109_vm1, %v2083_v16  ;;  %v2084_v5 = vadd.f32 %v3725_v41, %v1964_v50  ;;  %v2616_v17 = vpop.f32.mrb[103].mxu1 }
 0x473   :  { %2123 = vst.msk [vmem:[%s3956_s11 + $0x68] sm:$0xff] %vm2109_vm1, %v2084_v5 }
 0x476   :  { %v1751_v54 = vpop.f32.mrb[148].mxu0 }
 0x477   :  { %v1752_v4 = vadd.f32 %v3646_v61, %v1751_v54  ;;  %v2571_v33 = vpop.f32.mrb[149].mxu0 }
 0x478   :  { %v1754_v18 = vpop.f32.mrb[150].mxu0 }
 0x479   :  { %v1755_v23 = vadd.f32 %v3646_v61, %v1754_v18  ;;  %v2572_v1 = vpop.f32.mrb[151].mxu0  ;;  %v1794_v24 = vmax.f32 %v1752_v4, 0.0 }
 0x47b   :  { %v1795_v46 = vmax.f32 %v1755_v23, 0.0 }
 0x47d   :  { %v1814_v15 = vpack.c.bf16 %v1795_v46, %v1794_v24 }
 0x47f   :  { %2662 = vmatmul.mubr.bf16.gmra.mrb[148].mxu1 %v1814_v15 }
 0x481   :  { %v1969_v30 = vpop.f32.mrb[104].mxu1 }
 0x482   :  { %v2085_v14 = vadd.f32 %v3725_v41, %v1969_v30  ;;  %v2619_v21 = vpop.f32.mrb[105].mxu1 }
 0x483   :  { %v1972_v39 = vpop.f32.mrb[106].mxu1 }
 0x484   :  { %2124 = vst.msk [vmem:[%s3956_s11 + $0x70] sm:$0xff] %vm2109_vm1, %v2085_v14  ;;  %v2086_v40 = vadd.f32 %v3725_v41, %v1972_v39  ;;  %v2620_v42 = vpop.f32.mrb[107].mxu1 }
 0x486   :  { %2125 = vst.msk [vmem:[%s3956_s11 + $0x78] sm:$0xff] %vm2109_vm1, %v2086_v40 }
 0x494   :  { %v1977_v61 = vpop.f32.mrb[108].mxu1 }
 0x495   :  { %v2087_v0 = vadd.f32 %v3725_v41, %v1977_v61  ;;  %v2623_v32 = vpop.f32.mrb[109].mxu1 }
 0x496   :  { %v1980_v51 = vpop.f32.mrb[110].mxu1 }
 0x497   :  { %2126 = vst.msk [vmem:[%s3956_s11 + $0x80] sm:$0xff] %vm2109_vm1, %v2087_v0  ;;  %v2088_v20 = vadd.f32 %v3725_v41, %v1980_v51  ;;  %v2624_v43 = vpop.f32.mrb[111].mxu1 }
 0x499   :  { %2127 = vst.msk [vmem:[%s3956_s11 + $0x88] sm:$0xff] %vm2109_vm1, %v2088_v20 }
 0x4a7   :  { %v1985_v36 = vpop.f32.mrb[112].mxu1 }
 0x4a8   :  { %v2089_v44 = vadd.f32 %v3725_v41, %v1985_v36  ;;  %v2627_v7 = vpop.f32.mrb[113].mxu1 }
 0x4a9   :  { %v1988_v19 = vpop.f32.mrb[114].mxu1 }
 0x4aa   :  { %2128 = vst.msk [vmem:[%s3956_s11 + $0x90] sm:$0xff] %vm2109_vm1, %v2089_v44  ;;  %v2090_v12 = vadd.f32 %v3725_v41, %v1988_v19  ;;  %v2628_v47 = vpop.f32.mrb[115].mxu1 }
 0x4ac   :  { %2129 = vst.msk [vmem:[%s3956_s11 + $0x98] sm:$0xff] %vm2109_vm1, %v2090_v12 }
 0x4ba   :  { %v1993_v48 = vpop.f32.mrb[116].mxu1 }
 0x4bb   :  { %v2091_v52 = vadd.f32 %v3725_v41, %v1993_v48  ;;  %v2631_v53 = vpop.f32.mrb[117].mxu1 }
 0x4bc   :  { %v1996_v55 = vpop.f32.mrb[118].mxu1 }
 0x4bd   :  { %2130 = vst.msk [vmem:[%s3956_s11 + $0xa0] sm:$0xff] %vm2109_vm1, %v2091_v52  ;;  %v2092_v56 = vadd.f32 %v3725_v41, %v1996_v55  ;;  %v2632_v26 = vpop.f32.mrb[119].mxu1 }
 0x4bf   :  { %2131 = vst.msk [vmem:[%s3956_s11 + $0xa8] sm:$0xff] %vm2109_vm1, %v2092_v56 }
 0x4cd   :  { %v2001_v2 = vpop.f32.mrb[120].mxu1 }
 0x4ce   :  { %v2093_v29 = vadd.f32 %v3725_v41, %v2001_v2  ;;  %v2635_v57 = vpop.f32.mrb[121].mxu1 }
 0x4cf   :  { %v2004_v58 = vpop.f32.mrb[122].mxu1 }
 0x4d0   :  { %2132 = vst.msk [vmem:[%s3956_s11 + $0xb0] sm:$0xff] %vm2109_vm1, %v2093_v29  ;;  %v2094_v60 = vadd.f32 %v3725_v41, %v2004_v58  ;;  %v2636_v35 = vpop.f32.mrb[123].mxu1 }
 0x4d2   :  { %2133 = vst.msk [vmem:[%s3956_s11 + $0xb8] sm:$0xff] %vm2109_vm1, %v2094_v60 }
 0x4e0   :  { %v2009_v59 = vpop.f32.mrb[124].mxu1 }
 0x4e1   :  { %v2095_v62 = vadd.f32 %v3725_v41, %v2009_v59  ;;  %v2639_v25 = vpop.f32.mrb[125].mxu1 }
 0x4e2   :  { %v2012_v28 = vpop.f32.mrb[126].mxu1 }
 0x4e3   :  { %2134 = vst.msk [vmem:[%s3956_s11 + $0xc0] sm:$0xff] %vm2109_vm1, %v2095_v62  ;;  %v2096_v63 = vadd.f32 %v3725_v41, %v2012_v28  ;;  %v2640_v6 = vpop.f32.mrb[127].mxu1 }
 0x4e5   :  { %2135 = vst.msk [vmem:[%s3956_s11 + $0xc8] sm:$0xff] %vm2109_vm1, %v2096_v63 }
 0x4f3   :  { %v2017_v8 = vpop.f32.mrb[128].mxu1 }
 0x4f4   :  { %v2097_v37 = vadd.f32 %v3725_v41, %v2017_v8  ;;  %v2643_v10 = vpop.f32.mrb[129].mxu1 }
 0x4f5   :  { %v2020_v11 = vpop.f32.mrb[130].mxu1 }
 0x4f6   :  { %2136 = vst.msk [vmem:[%s3956_s11 + $0xd0] sm:$0xff] %vm2109_vm1, %v2097_v37  ;;  %v2098_v45 = vadd.f32 %v3725_v41, %v2020_v11  ;;  %v2644_v22 = vpop.f32.mrb[131].mxu1 }
 0x4f8   :  { %2137 = vst.msk [vmem:[%s3956_s11 + $0xd8] sm:$0xff] %vm2109_vm1, %v2098_v45 }
 0x506   :  { %v2025_v27 = vpop.f32.mrb[132].mxu1 }
 0x507   :  { %v2099_v3 = vadd.f32 %v3725_v41, %v2025_v27  ;;  %v2647_v9 = vpop.f32.mrb[133].mxu1 }
 0x508   :  { %v2028_v13 = vpop.f32.mrb[134].mxu1 }
 0x509   :  { %2138 = vst.msk [vmem:[%s3956_s11 + $0xe0] sm:$0xff] %vm2109_vm1, %v2099_v3  ;;  %v2100_v31 = vadd.f32 %v3725_v41, %v2028_v13  ;;  %v2648_v38 = vpop.f32.mrb[135].mxu1 }
 0x50b   :  { %2139 = vst.msk [vmem:[%s3956_s11 + $0xe8] sm:$0xff] %vm2109_vm1, %v2100_v31 }
 0x519   :  { %v2033_v49 = vpop.f32.mrb[136].mxu1 }
 0x51a   :  { %v2101_v16 = vadd.f32 %v3725_v41, %v2033_v49  ;;  %v2651_v34 = vpop.f32.mrb[137].mxu1 }
 0x51b   :  { %v2036_v50 = vpop.f32.mrb[138].mxu1 }
 0x51c   :  { %2140 = vst.msk [vmem:[%s3956_s11 + $0xf0] sm:$0xff] %vm2109_vm1, %v2101_v16  ;;  %v2102_v5 = vadd.f32 %v3725_v41, %v2036_v50  ;;  %v2652_v17 = vpop.f32.mrb[139].mxu1 }
 0x51e   :  { %2141 = vst.msk [vmem:[%s3956_s11 + $0xf8] sm:$0xff] %vm2109_vm1, %v2102_v5 }
 0x52c   :  { %v2041_v54 = vpop.f32.mrb[140].mxu1 }
 0x52d   :  { %v2103_v4 = vadd.f32 %v3725_v41, %v2041_v54  ;;  %v2655_v33 = vpop.f32.mrb[141].mxu1 }
 0x52e   :  { %v2044_v18 = vpop.f32.mrb[142].mxu1 }
 0x52f   :  { %2142 = vst.msk [vmem:[%s3956_s11 + $0x100] sm:$0xff] %vm2109_vm1, %v2103_v4  ;;  %v2104_v23 = vadd.f32 %v3725_v41, %v2044_v18  ;;  %v2656_v1 = vpop.f32.mrb[143].mxu1 }
 0x531   :  { %2143 = vst.msk [vmem:[%s3956_s11 + $0x108] sm:$0xff] %vm2109_vm1, %v2104_v23 }
 0x53f   :  { %v2049_v24 = vpop.f32.mrb[144].mxu1 }
 0x540   :  { %v2105_v46 = vadd.f32 %v3725_v41, %v2049_v24  ;;  %v2659_v15 = vpop.f32.mrb[145].mxu1 }
 0x541   :  { %v2052_v30 = vpop.f32.mrb[146].mxu1 }
 0x542   :  { %2144 = vst.msk [vmem:[%s3956_s11 + $0x110] sm:$0xff] %vm2109_vm1, %v2105_v46  ;;  %v2106_v14 = vadd.f32 %v3725_v41, %v2052_v30  ;;  %v2660_v21 = vpop.f32.mrb[147].mxu1 }
 0x544   :  { %2145 = vst.msk [vmem:[%s3956_s11 + $0x118] sm:$0xff] %vm2109_vm1, %v2106_v14 }
 0x552   :  { %v2057_v39 = vpop.f32.mrb[148].mxu1 }
 0x553   :  { %v2107_v40 = vadd.f32 %v3725_v41, %v2057_v39  ;;  %v2663_v42 = vpop.f32.mrb[149].mxu1 }
 0x554   :  { %v2060_v61 = vpop.f32.mrb[150].mxu1 }
 0x555   :  { %2146 = vst.msk [vmem:[%s3956_s11 + $0x120] sm:$0xff] %vm2109_vm1, %v2107_v40  ;;  %v2108_v0 = vadd.f32 %v3725_v41, %v2060_v61  ;;  %v2664_v32 = vpop.f32.mrb[151].mxu1 }
 0x557   :  { %2147 = vst.msk [vmem:[%s3956_s11 + $0x128] sm:$0xff] %vm2109_vm1, %v2108_v0 }

</bundles_post_ra>
